<compile_context>
chip_gen: v7x
topology: tpu7x:2x2x1
jax: 0.10.0
libtpu: 0.0.40
codegen_flags: <defaults>
</compile_context>

<pallas_src>
import numpy as np
import jax
import jax.numpy as jnp
from jax.experimental import pallas as pl
from jax.experimental.pallas import tpu as pltpu


def _round_up(x, m):
    return (x + m - 1) // m * m


def parser_fused_kernel(idx_ref, sel_ref, vals_ref, m_ref, b1_ref, w2_ref, b2_ref, o_ref):
    # idx_ref : (TB, NF)  int32  per-slot feature indices (padded slots hold 0)
    # sel_ref : (NF, K)   f32    selector: sel[f, k] = 1 iff one-hot column k belongs to slot f
    # vals_ref: (1, K)    f32    per-column target index within its slot; -1 in padding columns
    # m_ref   : (K, HP)   bf16   fused table: rows of slot f = E_f @ W1[:, f*50:(f+1)*50]^T
    # b1_ref  : (1, HP)   f32
    # w2_ref  : (HP, CP)  bf16   W2^T, zero-padded
    # b2_ref  : (1, CP)   f32
    # o_ref   : (TB, CP)  f32
    #
    # Broadcast each row's slot-index across that slot's one-hot column range with a tiny
    # matmul (exact: small integers), then build the one-hot on the VPU.
    idx_f = idx_ref[...].astype(jnp.float32)                                     # (TB, NF)
    targets = jnp.dot(idx_f, sel_ref[...], preferred_element_type=jnp.float32)   # (TB, K)
    onehot = jnp.where(jnp.abs(targets - vals_ref[...]) < 0.5, 1.0, 0.0)
    onehot = onehot.astype(jnp.bfloat16)                                          # (TB, K)

    # Fused embedding gather + hidden layer:  h = joint @ W1^T + b1  (f32 accumulation).
    h = jnp.dot(onehot, m_ref[...], preferred_element_type=jnp.float32) + b1_ref[...]
    h1 = h * h * h                                                                # cube in f32

    logits = jnp.dot(h1.astype(jnp.bfloat16), w2_ref[...],
                     preferred_element_type=jnp.float32) + b2_ref[...]
    o_ref[...] = jnp.maximum(logits, 0.0)                                         # F.relu


def prepare_fused_params(word_emb, pos_emb, dep_emb, n_w, n_p, n_d, w1, b1, w2, b2):
    """Pack embedding tables + Linear params into the kernel's fused, lane-dense layout."""
    word_emb = np.asarray(word_emb, np.float32)
    pos_emb = np.asarray(pos_emb, np.float32)
    dep_emb = np.asarray(dep_emb, np.float32)
    w1 = np.asarray(w1, np.float32)
    b1 = np.asarray(b1, np.float32)
    w2 = np.asarray(w2, np.float32)
    b2 = np.asarray(b2, np.float32)

    emb_dim = word_emb.shape[1]
    tables = [word_emb] * n_w + [pos_emb] * n_p + [dep_emb] * n_d    # per-slot tables
    n_feat = len(tables)
    H1 = w1.shape[0]
    C = w2.shape[0]

    offs = np.concatenate([[0], np.cumsum([t.shape[0] for t in tables])]).astype(np.int64)
    K = _round_up(int(offs[-1]), 128)     # one-hot width (sum of per-slot vocabs, padded)
    HP = _round_up(H1, 128)
    CP = _round_up(C, 128)
    NF = _round_up(n_feat, 8)

    m = np.zeros((K, HP), np.float32)
    sel = np.zeros((NF, K), np.float32)
    vals = np.full((1, K), -1.0, np.float32)   # -1 never matches an index >= 0
    for f, t in enumerate(tables):
        v = t.shape[0]
        o = int(offs[f])
        m[o:o + v, :H1] = t @ w1[:, f * emb_dim:(f + 1) * emb_dim].T
        sel[f, o:o + v] = 1.0
        vals[0, o:o + v] = np.arange(v, dtype=np.float32)

    b1p = np.zeros((1, HP), np.float32)
    b1p[0, :H1] = b1
    w2p = np.zeros((HP, CP), np.float32)
    w2p[:H1, :C] = w2.T
    b2p = np.zeros((1, CP), np.float32)
    b2p[0, :C] = b2

    return dict(
        m=jnp.asarray(m, jnp.bfloat16),
        sel=jnp.asarray(sel, jnp.float32),
        vals=jnp.asarray(vals, jnp.float32),
        b1p=jnp.asarray(b1p, jnp.float32),
        w2p=jnp.asarray(w2p, jnp.bfloat16),
        b2p=jnp.asarray(b2p, jnp.float32),
        n_feat=n_feat, nf_pad=NF, num_classes=C,
    )


def parser_forward(word_indices, pos_indices, dep_indices, params, *, tb=1024):
    m, sel, vals = params["m"], params["sel"], params["vals"]
    b1p, w2p, b2p = params["b1p"], params["w2p"], params["b2p"]
    n_feat, nf_pad, C = params["n_feat"], params["nf_pad"], params["num_classes"]

    B = word_indices.shape[0]
    idx = jnp.concatenate([word_indices, pos_indices, dep_indices], axis=1).astype(jnp.int32)
    # Pad the slot axis to NF (zero slots are masked by zero rows in `sel`) and the batch
    # axis to a tile multiple (padded rows produce finite junk that is sliced off below).
    tb_eff = min(tb, _round_up(B, 8))
    Bp = _round_up(B, tb_eff)
    idx_pad = jnp.pad(idx, ((0, Bp - B), (0, nf_pad - n_feat)))

    K, HP = m.shape
    CP = w2p.shape[1]
    grid = (Bp // tb_eff,)

    flops = 2 * Bp * (nf_pad * K + K * HP + HP * CP)
    bytes_accessed = (idx_pad.size * 4 + sel.size * 4 + vals.size * 4 + m.size * 2
                      + b1p.size * 4 + w2p.size * 2 + b2p.size * 4 + Bp * CP * 4)

    out = pl.pallas_call(
        parser_fused_kernel,
        out_shape=jax.ShapeDtypeStruct((Bp, CP), jnp.float32),
        grid=grid,
        in_specs=[
            pl.BlockSpec((tb_eff, nf_pad), lambda i: (i, 0)),
            # Constant index_maps: tables/weights are DMA'd once, stay VMEM-resident.
            pl.BlockSpec((nf_pad, K), lambda i: (0, 0)),
            pl.BlockSpec((1, K), lambda i: (0, 0)),
            pl.BlockSpec((K, HP), lambda i: (0, 0)),
            pl.BlockSpec((1, HP), lambda i: (0, 0)),
            pl.BlockSpec((HP, CP), lambda i: (0, 0)),
            pl.BlockSpec((1, CP), lambda i: (0, 0)),
        ],
        out_specs=pl.BlockSpec((tb_eff, CP), lambda i: (i, 0)),
        compiler_params=pltpu.CompilerParams(
            # TODO(synk): on v7x, confirm 2-TC sharding with xprof; switch the batch axis
            # to pltpu.CORE_PARALLEL / pl.core_map if it stays on one core.
            dimension_semantics=("parallel",),
            vmem_limit_bytes=32 * 1024 * 1024,
        ),
        cost_estimate=pl.CostEstimate(flops=flops, transcendentals=0,
                                      bytes_accessed=bytes_accessed),
    )(idx_pad, sel, vals, m, b1p, w2p, b2p)
    return out[:B, :C]


def reference_forward(word_emb, pos_emb, dep_emb, w_idx, p_idx, d_idx, w1, b1, w2, b2):
    # Mirrors the PyTorch module in plain f32 JAX.
    w_e = jnp.take(word_emb, w_idx, axis=0)
    p_e = jnp.take(pos_emb, p_idx, axis=0)
    d_e = jnp.take(dep_emb, d_idx, axis=0)
    joint = jnp.concatenate([w_e, p_e, d_e], axis=1).reshape(w_idx.shape[0], -1)
    h1 = jnp.power(joint @ w1.T + b1, 3)
    return jnp.maximum(h1 @ w2.T + b2, 0.0)


if __name__ == "__main__":
    # ---- small demo config (feature/hidden dims fixed by the module) ----
    n_w, n_p, n_d = 4, 4, 4          # word / pos / dep feature slots
    embedding_dim = 50
    l1_hidden_size = 200
    NUM_DEPS = 42
    num_classes = NUM_DEPS * 2 + 1   # 85
    batch = 128                      # small demo batch (training batch is 2048)
    vocab_w, vocab_p, vocab_d = 100, 45, 45
    D_in = (n_w + n_p + n_d) * embedding_dim   # 600

    key = jax.random.PRNGKey(0)
    keys = jax.random.split(key, 10)

    # Embedding tables (stand-ins for the supplied nn.Embedding modules).
    word_emb = jax.random.normal(keys[0], (vocab_w, embedding_dim), jnp.float32) * 0.1
    pos_emb = jax.random.normal(keys[1], (vocab_p, embedding_dim), jnp.float32) * 0.1
    dep_emb = jax.random.normal(keys[2], (vocab_d, embedding_dim), jnp.float32) * 0.1

    # Linear layer params, init uniform(-0.1, 0.1) like init_weights(), PyTorch layout.
    initrange = 0.1
    w1 = jax.random.uniform(keys[3], (l1_hidden_size, D_in), jnp.float32, -initrange, initrange)
    b1 = jax.random.uniform(keys[4], (l1_hidden_size,), jnp.float32, -initrange, initrange)
    w2 = jax.random.uniform(keys[5], (num_classes, l1_hidden_size), jnp.float32,
                            -initrange, initrange)
    b2 = jax.random.uniform(keys[6], (num_classes,), jnp.float32, -initrange, initrange)

    # Integer feature indices (the module's forward() inputs).
    word_indices = jax.random.randint(keys[7], (batch, n_w), 0, vocab_w)
    pos_indices = jax.random.randint(keys[8], (batch, n_p), 0, vocab_p)
    dep_indices = jax.random.randint(keys[9], (batch, n_d), 0, vocab_d)

    # ---- pack params once (offline), run the fused kernel ----
    params = prepare_fused_params(word_emb, pos_emb, dep_emb, n_w, n_p, n_d, w1, b1, w2, b2)
    fwd = jax.jit(lambda wi, pi, di: parser_forward(wi, pi, di, params, tb=1024))
    out = jax.block_until_ready(fwd(word_indices, pos_indices, dep_indices))

    ref = reference_forward(word_emb, pos_emb, dep_emb,
                            word_indices, pos_indices, dep_indices, w1, b1, w2, b2)

    assert out.shape == (batch, num_classes)
    # bf16 MXU operands with f32 accumulation -> loosened tolerance vs the f32 reference.
    assert jnp.allclose(out, ref, atol=2e-2, rtol=2e-2), "mismatch vs reference"

    print("KERNEL_OK")
</pallas_src>

<mosaic_0001>
module attributes {stable_mosaic.version = 11 : i64} {
  func.func @parser_fused_kernel(%arg0: i32, %arg1: memref<128x16xi32, #tpu.memory_space<vmem>>, %arg2: memref<16x768xf32, #tpu.memory_space<vmem>>, %arg3: memref<1x768xf32, #tpu.memory_space<vmem>>, %arg4: memref<768x256xbf16, #tpu.memory_space<vmem>>, %arg5: memref<1x256xf32, #tpu.memory_space<vmem>>, %arg6: memref<256x128xbf16, #tpu.memory_space<vmem>>, %arg7: memref<1x128xf32, #tpu.memory_space<vmem>>, %arg8: memref<128x128xf32, #tpu.memory_space<vmem>>) attributes {dimension_semantics = [#tpu.dimension_semantics<parallel>], iteration_bounds = array<i64: 1>, scalar_prefetch = 0 : i64, scratch_operands = 0 : i64, tpu.core_type = #tpu.core_type<tc>, window_params = [{transform_indices = @transform_0, window_bounds = array<i64: 128, 16>}, {pipeline_mode = #tpu.pipeline_mode<synchronous>, transform_indices = @transform_1, window_bounds = array<i64: 16, 768>}, {pipeline_mode = #tpu.pipeline_mode<synchronous>, transform_indices = @transform_2, window_bounds = array<i64: 1, 768>}, {pipeline_mode = #tpu.pipeline_mode<synchronous>, transform_indices = @transform_3, window_bounds = array<i64: 768, 256>}, {pipeline_mode = #tpu.pipeline_mode<synchronous>, transform_indices = @transform_4, window_bounds = array<i64: 1, 256>}, {pipeline_mode = #tpu.pipeline_mode<synchronous>, transform_indices = @transform_5, window_bounds = array<i64: 256, 128>}, {pipeline_mode = #tpu.pipeline_mode<synchronous>, transform_indices = @transform_6, window_bounds = array<i64: 1, 128>}, {transform_indices = @transform_7, window_bounds = array<i64: 128, 128>}]} {
    %c0 = arith.constant 0 : index
    %c0_0 = arith.constant 0 : index
    %0 = vector.load %arg1[%c0, %c0_0] : memref<128x16xi32, #tpu.memory_space<vmem>>, vector<128x16xi32>
    %1 = arith.sitofp %0 : vector<128x16xi32> to vector<128x16xf32>
    %c0_1 = arith.constant 0 : index
    %c0_2 = arith.constant 0 : index
    %2 = vector.load %arg2[%c0_1, %c0_2] : memref<16x768xf32, #tpu.memory_space<vmem>>, vector<16x768xf32>
    %cst = arith.constant dense<0.000000e+00> : vector<128x768xf32>
    %3 = tpu.matmul %1, %2, %cst {dimension_numbers = #tpu.dot_dimension_numbers<[1], [0], [0], [1], [0, 0, 1, 1], [], []>} : vector<128x16xf32>, vector<16x768xf32>, vector<128x768xf32> -> vector<128x768xf32>
    %c0_3 = arith.constant 0 : index
    %c0_4 = arith.constant 0 : index
    %4 = vector.load %arg3[%c0_3, %c0_4] : memref<1x768xf32, #tpu.memory_space<vmem>>, vector<1x768xf32>
    %5 = vector.broadcast %4 : vector<1x768xf32> to vector<128x768xf32>
    %6 = arith.subf %3, %5 : vector<128x768xf32>
    %7 = math.absf %6 : vector<128x768xf32>
    %cst_5 = arith.constant 5.000000e-01 : f32
    %8 = vector.broadcast %cst_5 : f32 to vector<128x768xf32>
    %9 = arith.cmpf olt, %7, %8 : vector<128x768xf32>
    %cst_6 = arith.constant 1.000000e+00 : f32
    %cst_7 = arith.constant 0.000000e+00 : f32
    %10 = vector.broadcast %cst_6 : f32 to vector<128x768xf32>
    %11 = vector.broadcast %cst_7 : f32 to vector<128x768xf32>
    %12 = arith.select %9, %10, %11 : vector<128x768xi1>, vector<128x768xf32>
    %13 = arith.truncf %12 : vector<128x768xf32> to vector<128x768xbf16>
    %c0_8 = arith.constant 0 : index
    %c0_9 = arith.constant 0 : index
    %14 = vector.load %arg4[%c0_8, %c0_9] : memref<768x256xbf16, #tpu.memory_space<vmem>>, vector<768x256xbf16>
    %cst_10 = arith.constant dense<0.000000e+00> : vector<128x256xf32>
    %15 = tpu.matmul %13, %14, %cst_10 {dimension_numbers = #tpu.dot_dimension_numbers<[1], [0], [0], [1], [0, 0, 1, 1], [], []>} : vector<128x768xbf16>, vector<768x256xbf16>, vector<128x256xf32> -> vector<128x256xf32>
    %c0_11 = arith.constant 0 : index
    %c0_12 = arith.constant 0 : index
    %16 = vector.load %arg5[%c0_11, %c0_12] : memref<1x256xf32, #tpu.memory_space<vmem>>, vector<1x256xf32>
    %17 = vector.broadcast %16 : vector<1x256xf32> to vector<128x256xf32>
    %18 = arith.addf %15, %17 : vector<128x256xf32>
    %19 = arith.mulf %18, %18 : vector<128x256xf32>
    %20 = arith.mulf %19, %18 : vector<128x256xf32>
    %21 = arith.truncf %20 : vector<128x256xf32> to vector<128x256xbf16>
    %c0_13 = arith.constant 0 : index
    %c0_14 = arith.constant 0 : index
    %22 = vector.load %arg6[%c0_13, %c0_14] : memref<256x128xbf16, #tpu.memory_space<vmem>>, vector<256x128xbf16>
    %cst_15 = arith.constant dense<0.000000e+00> : vector<128x128xf32>
    %23 = tpu.matmul %21, %22, %cst_15 {dimension_numbers = #tpu.dot_dimension_numbers<[1], [0], [0], [1], [0, 0, 1, 1], [], []>} : vector<128x256xbf16>, vector<256x128xbf16>, vector<128x128xf32> -> vector<128x128xf32>
    %c0_16 = arith.constant 0 : index
    %c0_17 = arith.constant 0 : index
    %24 = vector.load %arg7[%c0_16, %c0_17] : memref<1x128xf32, #tpu.memory_space<vmem>>, vector<1x128xf32>
    %25 = vector.broadcast %24 : vector<1x128xf32> to vector<128x128xf32>
    %26 = arith.addf %23, %25 : vector<128x128xf32>
    %cst_18 = arith.constant 0.000000e+00 : f32
    %27 = vector.broadcast %cst_18 : f32 to vector<128x128xf32>
    %28 = arith.maximumf %26, %27 : vector<128x128xf32>
    %c0_19 = arith.constant 0 : index
    %c0_20 = arith.constant 0 : index
    %29 = vector.load %arg8[%c0_19, %c0_20] : memref<128x128xf32, #tpu.memory_space<vmem>>, vector<128x128xf32>
    tpu.vector_store %arg8[%c0_19, %c0_20], %28 {strides = array<i32>} : memref<128x128xf32, #tpu.memory_space<vmem>>, vector<128x128xf32>,
    return
  }
  func.func @transform_0(%arg0: i32) -> (i32, i32) {
    %c0_i32 = arith.constant 0 : i32
    %c0_i32_0 = arith.constant 0 : i32
    return %arg0, %c0_i32 : i32, i32
  }
  func.func @transform_1(%arg0: i32) -> (i32, i32) {
    %c0_i32 = arith.constant 0 : i32
    %c0_i32_0 = arith.constant 0 : i32
    %c0_i32_1 = arith.constant 0 : i32
    return %c0_i32, %c0_i32_0 : i32, i32
  }
  func.func @transform_2(%arg0: i32) -> (i32, i32) {
    %c0_i32 = arith.constant 0 : i32
    %c0_i32_0 = arith.constant 0 : i32
    %c0_i32_1 = arith.constant 0 : i32
    return %c0_i32, %c0_i32_0 : i32, i32
  }
  func.func @transform_3(%arg0: i32) -> (i32, i32) {
    %c0_i32 = arith.constant 0 : i32
    %c0_i32_0 = arith.constant 0 : i32
    %c0_i32_1 = arith.constant 0 : i32
    return %c0_i32, %c0_i32_0 : i32, i32
  }
  func.func @transform_4(%arg0: i32) -> (i32, i32) {
    %c0_i32 = arith.constant 0 : i32
    %c0_i32_0 = arith.constant 0 : i32
    %c0_i32_1 = arith.constant 0 : i32
    return %c0_i32, %c0_i32_0 : i32, i32
  }
  func.func @transform_5(%arg0: i32) -> (i32, i32) {
    %c0_i32 = arith.constant 0 : i32
    %c0_i32_0 = arith.constant 0 : i32
    %c0_i32_1 = arith.constant 0 : i32
    return %c0_i32, %c0_i32_0 : i32, i32
  }
  func.func @transform_6(%arg0: i32) -> (i32, i32) {
    %c0_i32 = arith.constant 0 : i32
    %c0_i32_0 = arith.constant 0 : i32
    %c0_i32_1 = arith.constant 0 : i32
    return %c0_i32, %c0_i32_0 : i32, i32
  }
  func.func @transform_7(%arg0: i32) -> (i32, i32) {
    %c0_i32 = arith.constant 0 : i32
    %c0_i32_0 = arith.constant 0 : i32
    return %arg0, %c0_i32 : i32, i32
  }
}

</mosaic_0001>

<bundles_post_ra>
// kernel: _lambda_.1
= control target key start
LH: loop header
LB: loop body
LE: loop exit
PB: predicated region body
PF: predicated region fallthrough
CT: control target
= control target key end

     0   :  { %v2996_v3 = vmov 0.0   ;;  %vm71_vm0 = vcmask 130048   ;;  %s4251_s1 = inlined_call_operand.vmem [shape: f32[16,768], index: 1, kind: input, shape index: {}]   ;;  %s4252_s0 = inlined_call_operand.vmem [shape: s32[128,16], index: 0, kind: input, shape index: {}]   ;;  %s4253_s3 = inlined_call_operand.vmem [shape: bf16[768,256], index: 3, kind: input, shape index: {}]   ;;  %s4254_s2 = inlined_call_operand.vmem [shape: f32[1,768], index: 2, kind: input, shape index: {}]   ;;  %s4255_s5 = inlined_call_operand.vmem [shape: bf16[256,128], index: 5, kind: input, shape index: {}]   ;;  %s4256_s4 = inlined_call_operand.vmem [shape: f32[1,256], index: 4, kind: input, shape index: {}]   ;;  %s4257_s6 = inlined_call_operand.vmem [shape: f32[1,128], index: 6, kind: input, shape index: {}]   ;;  %s4258_s7 = inlined_call_operand.vmem [shape: f32[128,128], index: 7, kind: output, shape index: {}]  }
   0x1   :  { %v60_v0 = vld [vmem:[%s4251_s1 + $0x8] sm:$0xff]  ;;  %v66_v1 = vld [vmem:[%s4251_s1 + $0x38] sm:$0xff]  ;;  %v59_v2 = vld [vmem:[%s4251_s1] sm:$0xff]  ;;  %184 = vmatprep.mubr.f32.mxu0 %v2996_v3  ;;  %345 = vmatprep.mubr.f32.mxu1 %v2996_v3 }
   0x2   :  { %v2663_v4 = vpack.c.bf16 %v66_v1, %v60_v0  ;;  %v65_v5 = vld [vmem:[%s4251_s1 + $0x30] sm:$0xff]  ;;  %v27_v6 = vld [vmem:[%s4252_s0] sm:$0xff]  ;;  %v28_v9 = vld [vmem:[%s4252_s0 + $0x8] sm:$0xff] }
   0x3   :  { %v2665_v7 = vpack.c.bf16 %v65_v5, %v59_v2  ;;  %v3055_v8 = vcvt.s32.f32 %v27_v6  ;;  %v64_v10 = vld [vmem:[%s4251_s1 + $0x28] sm:$0xff]  ;;  %v70_v11 = vld [vmem:[%s4251_s1 + $0x58] sm:$0xff]  ;;  %v63_v13 = vld [vmem:[%s4251_s1 + $0x20] sm:$0xff]  ;;  %v3074_v16 = vcvt.s32.f32 %v28_v9 }
   0x4   :  { %2664 = vmatprep.subr.bf16.mxu0 %v2663_v4  ;;  %v2671_v12 = vpack.c.bf16 %v70_v11, %v64_v10  ;;  %v69_v14 = vld [vmem:[%s4251_s1 + $0x50] sm:$0xff]  ;;  %v62_v17 = vld [vmem:[%s4251_s1 + $0x18] sm:$0xff]  ;;  %v68_v18 = vld [vmem:[%s4251_s1 + $0x48] sm:$0xff] }
   0x5   :  { %2666 = vmatpush1.bf16.msra.mxu0 %v2665_v7  ;;  %v2673_v15 = vpack.c.bf16 %v69_v14, %v63_v13  ;;  %v29_v19 = vld [vmem:[%s4252_s0 + $0x10] sm:$0xff]  ;;  %v2667_v20 = vpack.c.bf16 %v68_v18, %v62_v17  ;;  %v67_v22 = vld [vmem:[%s4251_s1 + $0x40] sm:$0xff]  ;;  %v30_v26 = vld [vmem:[%s4252_s0 + $0x18] sm:$0xff] }
   0x6   :  { %2672 = vmatprep.subr.bf16.mxu0 %v2671_v12  ;;  %v61_v21 = vld [vmem:[%s4251_s1 + $0x10] sm:$0xff]  ;;  %v2807_v24 = vld [vmem:[%s4253_s3 + $0x4] ss:$8 sps:$4 sm:$0xff]   ;;  %v3097_v25 = vcvt.s32.f32 %v29_v19  ;;  %v2805_v27 = vld [vmem:[%s4253_s3] ss:$8 sps:$4 sm:$0xff]   ;;  %v3113_v29 = vcvt.s32.f32 %v30_v26 }
   0x7   :  { %v2669_v23 = vpack.c.bf16 %v67_v22, %v61_v21  ;;  %2668 = vmatprep.subr.bf16.mxu1 %v2667_v20  ;;  %v2810_v28 = vld [vmem:[%s4253_s3 + $0x14] ss:$8 sps:$4 sm:$0xff]   ;;  %v31_v30 = vld [vmem:[%s4252_s0 + $0x20] sm:$0xff]  ;;  %v2808_v31 = vld [vmem:[%s4253_s3 + $0x10] ss:$8 sps:$4 sm:$0xff]  }
   0x8   :  { %2342 = vmatmul.mubr.msk.f32.vlgmr.msra.gmra.mrb[0].mxu0 %vm71_vm0, %v3055_v8  ;;  %v2813_v32 = vld [vmem:[%s4253_s3 + $0x24] ss:$8 sps:$4 sm:$0xff]   ;;  %v3130_v33 = vcvt.s32.f32 %v31_v30  ;;  %v2811_v35 = vld [vmem:[%s4253_s3 + $0x20] ss:$8 sps:$4 sm:$0xff]   ;;  %v2816_v36 = vld [vmem:[%s4253_s3 + $0x34] ss:$8 sps:$4 sm:$0xff]  }
   0x9   :  { %190 = vmatprep.mubr.f32.mxu0 %v2996_v3  ;;  %2674 = vmatpush1.bf16.msra.mxu0 %v2673_v15  ;;  %v32_v34 = vld [vmem:[%s4252_s0 + $0x28] sm:$0xff]  ;;  %v33_v38 = vld [vmem:[%s4252_s0 + $0x30] sm:$0xff]  ;;  %v34_v41 = vld [vmem:[%s4252_s0 + $0x38] sm:$0xff] }
   0xa   :  { %2670 = vmatpush1.bf16.msra.mxu1 %v2669_v23  ;;  %v3147_v37 = vcvt.s32.f32 %v32_v34  ;;  %v2814_v39 = vld [vmem:[%s4253_s3 + $0x30] ss:$8 sps:$4 sm:$0xff]   ;;  %v2819_v40 = vld [vmem:[%s4253_s3 + $0x44] ss:$8 sps:$4 sm:$0xff]   ;;  %v2817_v42 = vld [vmem:[%s4253_s3 + $0x40] ss:$8 sps:$4 sm:$0xff]   ;;  %v3170_v43 = vcvt.s32.f32 %v33_v38  ;;  %v3187_v47 = vcvt.s32.f32 %v34_v41 }
   0xb   :  { %1655 = vmatprep.subr.bf16.mxu1 %v2807_v24  ;;  %v2822_v44 = vld [vmem:[%s4253_s3 + $0x54] ss:$8 sps:$4 sm:$0xff]   ;;  %v35_v45 = vld [vmem:[%s4252_s0 + $0x40] sm:$0xff]  ;;  %v2820_v46 = vld [vmem:[%s4253_s3 + $0x50] ss:$8 sps:$4 sm:$0xff]  }
   0xc   :  { %2343 = vmatmul.mubr.msk.f32.gmra.mrb[2].mxu0 %vm71_vm0, %v3074_v16  ;;  %v2825_v48 = vld [vmem:[%s4253_s3 + $0x64] ss:$8 sps:$4 sm:$0xff]   ;;  %v2823_v50 = vld [vmem:[%s4253_s3 + $0x60] ss:$8 sps:$4 sm:$0xff]   ;;  %v3204_v51 = vcvt.s32.f32 %v35_v45  ;;  %v2828_v52 = vld [vmem:[%s4253_s3 + $0x74] ss:$8 sps:$4 sm:$0xff]  }
   0xd   :  { %196 = vmatprep.mubr.f32.mxu0 %v2996_v3  ;;  %2358 = vmatmul.mubr.msk.f32.vlgmr.msra.gmra.mrb[0].mxu1 %vm71_vm0, %v3055_v8  ;;  %v36_v49 = vld [vmem:[%s4252_s0 + $0x48] sm:$0xff]  ;;  %v37_v53 = vld [vmem:[%s4252_s0 + $0x50] sm:$0xff]  ;;  %v38_v57 = vld [vmem:[%s4252_s0 + $0x58] sm:$0xff] }
   0xe   :  { %351 = vmatprep.mubr.f32.mxu1 %v2996_v3  ;;  %1656 = vmatpush1.bf16.msra.mxu1 %v2805_v27  ;;  %v2826_v54 = vld [vmem:[%s4253_s3 + $0x70] ss:$8 sps:$4 sm:$0xff]   ;;  %v3221_v55 = vcvt.s32.f32 %v36_v49  ;;  %v2831_v56 = vld [vmem:[%s4253_s3 + $0x84] ss:$8 sps:$4 sm:$0xff]   ;;  %v2829_v58 = vld [vmem:[%s4253_s3 + $0x80] ss:$8 sps:$4 sm:$0xff]   ;;  %v3238_v59 = vcvt.s32.f32 %v37_v53  ;;  %v3255_v63 = vcvt.s32.f32 %v38_v57 }
   0xf   :  { %1657 = vmatprep.subr.bf16.mxu1 %v2810_v28  ;;  %v2834_v60 = vld [vmem:[%s4253_s3 + $0x94] ss:$8 sps:$4 sm:$0xff]   ;;  %v39_v61 = vld [vmem:[%s4252_s0 + $0x60] sm:$0xff]  ;;  %v2832_v62 = vld [vmem:[%s4253_s3 + $0x90] ss:$8 sps:$4 sm:$0xff]  }
  0x10   :  { %2344 = vmatmul.mubr.msk.f32.gmra.mrb[4].mxu0 %vm71_vm0, %v3097_v25  ;;  %v2837_v0 = vld [vmem:[%s4253_s3 + $0xa4] ss:$8 sps:$4 sm:$0xff]   ;;  %v3266_v1 = vcvt.s32.f32 %v39_v61  ;;  %v2835_v4 = vld [vmem:[%s4253_s3 + $0xa0] ss:$8 sps:$4 sm:$0xff]   ;;  %v2840_v5 = vld [vmem:[%s4253_s3 + $0xb4] ss:$8 sps:$4 sm:$0xff]  }
  0x11   :  { %202 = vmatprep.mubr.f32.mxu0 %v2996_v3  ;;  %2359 = vmatmul.mubr.msk.f32.gmra.mrb[2].mxu1 %vm71_vm0, %v3074_v16  ;;  %v40_v2 = vld [vmem:[%s4252_s0 + $0x68] sm:$0xff]  ;;  %v41_v7 = vld [vmem:[%s4252_s0 + $0x70] sm:$0xff]  ;;  %v42_v12 = vld [vmem:[%s4252_s0 + $0x78] sm:$0xff] }
  0x12   :  { %357 = vmatprep.mubr.f32.mxu1 %v2996_v3  ;;  %1658 = vmatpush1.bf16.msra.mxu1 %v2808_v31  ;;  %v3283_v6 = vcvt.s32.f32 %v40_v2  ;;  %v2838_v9 = vld [vmem:[%s4253_s3 + $0xb0] ss:$8 sps:$4 sm:$0xff]   ;;  %v2843_v10 = vld [vmem:[%s4253_s3 + $0xc4] ss:$8 sps:$4 sm:$0xff]   ;;  %v3300_v11 = vcvt.s32.f32 %v41_v7  ;;  %v2841_v13 = vld [vmem:[%s4253_s3 + $0xc0] ss:$8 sps:$4 sm:$0xff]   ;;  %v3314_v14 = vcvt.s32.f32 %v42_v12 }
  0x13   :  { %1659 = vmatprep.subr.bf16.mxu1 %v2813_v32  ;;  %v2844_v15 = vld [vmem:[%s4253_s3 + $0xd0] ss:$8 sps:$4 sm:$0xff]   ;;  %v2847_v17 = vld [vmem:[%s4253_s3 + $0xe0] ss:$8 sps:$4 sm:$0xff]   ;;  %v2852_v18 = vld [vmem:[%s4253_s3 + $0xf4] ss:$8 sps:$4 sm:$0xff]  }
  0x14   :  { %2345 = vmatmul.mubr.msk.f32.gmra.mrb[6].mxu0 %vm71_vm0, %v3113_v29  ;;  %v2850_v19 = vld [vmem:[%s4253_s3 + $0xf0] ss:$8 sps:$4 sm:$0xff]   ;;  %v2855_v20 = vld [vmem:[%s4253_s3 + $0x104] ss:$8 sps:$4 sm:$0xff]   ;;  %v2856_v22 = vld [vmem:[%s4253_s3 + $0x200] ss:$8 sps:$4 sm:$0xff]  }
  0x15   :  { %208 = vmatprep.mubr.f32.mxu0 %v2996_v3  ;;  %2360 = vmatmul.mubr.msk.f32.gmra.mrb[4].mxu1 %vm71_vm0, %v3097_v25  ;;  %v3379_v21 = vld [vmem:[%s4253_s3 + $0x204] ss:$8 sps:$4 sm:$0xff]   ;;  %v2864_v23 = vld [vmem:[%s4253_s3 + $0x214] ss:$8 sps:$4 sm:$0xff]   ;;  %v2862_v24 = vld [vmem:[%s4253_s3 + $0x210] ss:$8 sps:$4 sm:$0xff]  }
  0x16   :  { %363 = vmatprep.mubr.f32.mxu1 %v2996_v3  ;;  %1660 = vmatpush1.bf16.msra.mxu1 %v2811_v35  ;;  %v2868_v26 = vld [vmem:[%s4253_s3 + $0x220] ss:$8 sps:$4 sm:$0xff]   ;;  %v2876_v27 = vld [vmem:[%s4253_s3 + $0x234] ss:$8 sps:$4 sm:$0xff]   ;;  %v2874_v28 = vld [vmem:[%s4253_s3 + $0x230] ss:$8 sps:$4 sm:$0xff]  }
  0x17   :  { %1661 = vmatprep.subr.bf16.mxu1 %v2816_v36  ;;  %1881 = vmatprep.subr.bf16.mxu0 %v3379_v21  ;;  %v2880_v30 = vld [vmem:[%s4253_s3 + $0x240] ss:$8 sps:$4 sm:$0xff]   ;;  %v2888_v31 = vld [vmem:[%s4253_s3 + $0x254] ss:$8 sps:$4 sm:$0xff]   ;;  %v2886_v32 = vld [vmem:[%s4253_s3 + $0x250] ss:$8 sps:$4 sm:$0xff]  }
  0x18   :  { %2346 = vmatmul.mubr.msk.f32.gmra.mrb[8].mxu0 %vm71_vm0, %v3130_v33  ;;  %v2892_v34 = vld [vmem:[%s4253_s3 + $0x260] ss:$8 sps:$4 sm:$0xff]   ;;  %v2900_v35 = vld [vmem:[%s4253_s3 + $0x274] ss:$8 sps:$4 sm:$0xff]   ;;  %v2898_v36 = vld [vmem:[%s4253_s3 + $0x270] ss:$8 sps:$4 sm:$0xff]  }
  0x19   :  { %214 = vmatprep.mubr.f32.mxu0 %v2996_v3  ;;  %2361 = vmatmul.mubr.msk.f32.gmra.mrb[6].mxu1 %vm71_vm0, %v3113_v29  ;;  %v2912_v38 = vld [vmem:[%s4253_s3 + $0x294] ss:$8 sps:$4 sm:$0xff]   ;;  %v2916_v41 = vld [vmem:[%s4253_s3 + $0x2a0] ss:$8 sps:$4 sm:$0xff]  }
  0x1a   :  { %369 = vmatprep.mubr.f32.mxu1 %v2996_v3  ;;  %1662 = vmatpush1.bf16.msra.mxu1 %v2814_v39  ;;  %v2910_v39 = vld [vmem:[%s4253_s3 + $0x290] ss:$8 sps:$4 sm:$0xff]   ;;  %v2928_v45 = vld [vmem:[%s4253_s3 + $0x2c0] ss:$8 sps:$4 sm:$0xff]  }
  0x1b   :  { %1663 = vmatprep.subr.bf16.mxu1 %v2819_v40  ;;  %v2918_v40 = vld [vmem:[%s4253_s3 + $0x2a4] ss:$8 sps:$4 sm:$0xff]   ;;  %v2940_v49 = vld [vmem:[%s4253_s3 + $0x2e0] ss:$8 sps:$4 sm:$0xff]  }
  0x1c   :  { %2347 = vmatmul.mubr.msk.f32.gmra.mrb[10].mxu0 %vm71_vm0, %v3147_v37 }
  0x1d   :  { %220 = vmatprep.mubr.f32.mxu0 %v2996_v3  ;;  %2362 = vmatmul.mubr.msk.f32.gmra.mrb[8].mxu1 %vm71_vm0, %v3130_v33 }
  0x1e   :  { %375 = vmatprep.mubr.f32.mxu1 %v2996_v3  ;;  %1664 = vmatpush1.bf16.msra.mxu1 %v2817_v42  ;;  %v2924_v42 = vld [vmem:[%s4253_s3 + $0x2b4] ss:$8 sps:$4 sm:$0xff]  }
  0x1f   :  { %1665 = vmatprep.subr.bf16.mxu1 %v2822_v44  ;;  %v2930_v44 = vld [vmem:[%s4253_s3 + $0x2c4] ss:$8 sps:$4 sm:$0xff]  }
  0x20   :  { %2348 = vmatmul.mubr.msk.f32.gmra.mrb[12].mxu0 %vm71_vm0, %v3170_v43 }
  0x21   :  { %226 = vmatprep.mubr.f32.mxu0 %v2996_v3  ;;  %2363 = vmatmul.mubr.msk.f32.gmra.mrb[10].mxu1 %vm71_vm0, %v3147_v37 }
  0x22   :  { %381 = vmatprep.mubr.f32.mxu1 %v2996_v3  ;;  %1666 = vmatpush1.bf16.msra.mxu1 %v2820_v46  ;;  %v2936_v46 = vld [vmem:[%s4253_s3 + $0x2d4] ss:$8 sps:$4 sm:$0xff]  }
  0x23   :  { %1667 = vmatprep.subr.bf16.mxu1 %v2825_v48  ;;  %v2942_v48 = vld [vmem:[%s4253_s3 + $0x2e4] ss:$8 sps:$4 sm:$0xff]  }
  0x24   :  { %2349 = vmatmul.mubr.msk.f32.gmra.mrb[14].mxu0 %vm71_vm0, %v3187_v47 }
  0x25   :  { %232 = vmatprep.mubr.f32.mxu0 %v2996_v3  ;;  %2364 = vmatmul.mubr.msk.f32.gmra.mrb[12].mxu1 %vm71_vm0, %v3170_v43 }
  0x26   :  { %387 = vmatprep.mubr.f32.mxu1 %v2996_v3  ;;  %1668 = vmatpush1.bf16.msra.mxu1 %v2823_v50  ;;  %v2948_v50 = vld [vmem:[%s4253_s3 + $0x2f4] ss:$8 sps:$4 sm:$0xff]  }
  0x27   :  { %1669 = vmatprep.subr.bf16.mxu1 %v2828_v52  ;;  %v605_v52 = vlaneseq }
  0x28   :  { %2350 = vmatmul.mubr.msk.f32.gmra.mrb[16].mxu0 %vm71_vm0, %v3204_v51 }
  0x29   :  { %238 = vmatprep.mubr.f32.mxu0 %v2996_v3  ;;  %2365 = vmatmul.mubr.msk.f32.gmra.mrb[14].mxu1 %vm71_vm0, %v3187_v47  ;;  %v3496_v53 = vshrl.u32 %v605_v52, 7  ;;  %v2865_v52 = vld [vmem:[%s4253_s3 + $0x120] ss:$8 sps:$4 sm:$0xff]  }
  0x2a   :  { %393 = vmatprep.mubr.f32.mxu1 %v2996_v3  ;;  %1670 = vmatpush1.bf16.msra.mxu1 %v2826_v54 }
  0x2b   :  { %1671 = vmatprep.subr.bf16.mxu1 %v2831_v56  ;;  %v607_v54 = vsub.s32 0, %v3496_v53  ;;  %v611_v56 = vsub.s32 1, %v3496_v53 }
  0x2c   :  { %2351 = vmatmul.mubr.msk.f32.gmra.mrb[18].mxu0 %vm71_vm0, %v3221_v55 }
  0x2d   :  { %244 = vmatprep.mubr.f32.mxu0 %v2996_v3  ;;  %2366 = vmatmul.mubr.msk.f32.gmra.mrb[16].mxu1 %vm71_vm0, %v3204_v51 }
  0x2e   :  { %399 = vmatprep.mubr.f32.mxu1 %v2996_v3  ;;  %1672 = vmatpush1.bf16.msra.mxu1 %v2829_v58 }
  0x2f   :  { %1673 = vmatprep.subr.bf16.mxu1 %v2834_v60  ;;  %v615_v60 = vsub.s32 2, %v3496_v53 }
  0x30   :  { %2352 = vmatmul.mubr.msk.f32.gmra.mrb[20].mxu0 %vm71_vm0, %v3238_v59 }
  0x31   :  { %250 = vmatprep.mubr.f32.mxu0 %v2996_v3  ;;  %2367 = vmatmul.mubr.msk.f32.gmra.mrb[18].mxu1 %vm71_vm0, %v3221_v55 }
  0x32   :  { %405 = vmatprep.mubr.f32.mxu1 %v2996_v3  ;;  %1674 = vmatpush1.bf16.msra.mxu1 %v2832_v62 }
  0x33   :  { %1675 = vmatprep.subr.bf16.mxu1 %v2837_v0 }
  0x34   :  { %2353 = vmatmul.mubr.msk.f32.gmra.mrb[22].mxu0 %vm71_vm0, %v3255_v63 }
  0x35   :  { %256 = vmatprep.mubr.f32.mxu0 %v2996_v3  ;;  %2368 = vmatmul.mubr.msk.f32.gmra.mrb[20].mxu1 %vm71_vm0, %v3238_v59 }
  0x36   :  { %411 = vmatprep.mubr.f32.mxu1 %v2996_v3  ;;  %1676 = vmatpush1.bf16.msra.mxu1 %v2835_v4 }
  0x37   :  { %1677 = vmatprep.subr.bf16.mxu1 %v2840_v5 }
  0x38   :  { %2354 = vmatmul.mubr.msk.f32.gmra.mrb[24].mxu0 %vm71_vm0, %v3266_v1 }
  0x39   :  { %262 = vmatprep.mubr.f32.mxu0 %v2996_v3  ;;  %2369 = vmatmul.mubr.msk.f32.gmra.mrb[22].mxu1 %vm71_vm0, %v3255_v63 }
  0x3a   :  { %417 = vmatprep.mubr.f32.mxu1 %v2996_v3  ;;  %1678 = vmatpush1.bf16.msra.mxu1 %v2838_v9 }
  0x3b   :  { %1679 = vmatprep.subr.bf16.mxu1 %v2843_v10 }
  0x3c   :  { %2355 = vmatmul.mubr.msk.f32.gmra.mrb[26].mxu0 %vm71_vm0, %v3283_v6 }
  0x3d   :  { %268 = vmatprep.mubr.f32.mxu0 %v2996_v3  ;;  %2370 = vmatmul.mubr.msk.f32.gmra.mrb[24].mxu1 %vm71_vm0, %v3266_v1 }
  0x3e   :  { %423 = vmatprep.mubr.f32.mxu1 %v2996_v3  ;;  %1680 = vmatpush1.bf16.msra.mxu1 %v2841_v13 }
  0x40   :  { %2356 = vmatmul.mubr.msk.f32.gmra.mrb[28].mxu0 %vm71_vm0, %v3300_v11 }
  0x41   :  { %274 = vmatprep.mubr.f32.mxu0 %v2996_v3  ;;  %2371 = vmatmul.mubr.msk.f32.gmra.mrb[26].mxu1 %vm71_vm0, %v3283_v6 }
  0x42   :  { %429 = vmatprep.mubr.f32.mxu1 %v2996_v3 }
  0x44   :  { %2357 = vmatmul.mubr.msk.f32.gmra.mrb[30].mxu0 %vm71_vm0, %v3314_v14 }
  0x45   :  { %506 = vmatprep.mubr.f32.mxu0 %v2996_v3  ;;  %2372 = vmatmul.mubr.msk.f32.gmra.mrb[28].mxu1 %vm71_vm0, %v3300_v11 }
  0x46   :  { %435 = vmatprep.mubr.f32.mxu1 %v2996_v3 }
  0x48   :  { %2374 = vmatmul.mubr.msk.f32.vlgmr.msra.gmra.mrb[32].mxu0 %vm71_vm0, %v3055_v8  ;;  %v2846_v8 = vld [vmem:[%s4253_s3 + $0xd4] ss:$8 sps:$4 sm:$0xff]  }
  0x49   :  { %512 = vmatprep.mubr.f32.mxu0 %v2996_v3  ;;  %2373 = vmatmul.mubr.msk.f32.gmra.mrb[30].mxu1 %vm71_vm0, %v3314_v14 }
  0x4a   :  { %1681 = vmatprep.subr.bf16.mxu1 %v2846_v8  ;;  %1882 = vmatpush1.bf16.msra.mxu0 %v2856_v22  ;;  %v2853_v22 = vld [vmem:[%s4253_s3 + $0x100] ss:$8 sps:$4 sm:$0xff]  }
  0x4b   :  { %1682 = vmatpush1.bf16.msra.mxu1 %v2844_v15  ;;  %1883 = vmatprep.subr.bf16.mxu0 %v2864_v23 }
  0x4c   :  { %2375 = vmatmul.mubr.msk.f32.gmra.mrb[34].mxu0 %vm71_vm0, %v3074_v16  ;;  %v2849_v16 = vld [vmem:[%s4253_s3 + $0xe4] ss:$8 sps:$4 sm:$0xff]  }
  0x4d   :  { %518 = vmatprep.mubr.f32.mxu0 %v2996_v3  ;;  %1683 = vmatprep.subr.bf16.mxu1 %v2849_v16 }
  0x4e   :  { %1884 = vmatpush1.bf16.msra.mxu0 %v2862_v24 }
  0x4f   :  { %1684 = vmatpush1.bf16.msra.mxu1 %v2847_v17 }
  0x50   :  { %2376 = vmatmul.mubr.msk.f32.gmra.mrb[36].mxu0 %vm71_vm0, %v3097_v25  ;;  %1685 = vmatprep.subr.bf16.mxu1 %v2852_v18  ;;  %v2870_v25 = vld [vmem:[%s4253_s3 + $0x224] ss:$8 sps:$4 sm:$0xff]  }
  0x51   :  { %524 = vmatprep.mubr.f32.mxu0 %v2996_v3  ;;  %1885 = vmatprep.subr.bf16.mxu0 %v2870_v25  ;;  %v2861_v25 = vld [vmem:[%s4253_s3 + $0x114] ss:$8 sps:$4 sm:$0xff]  }
  0x52   :  { %1886 = vmatpush1.bf16.msra.mxu0 %v2868_v26 }
  0x53   :  { %1686 = vmatpush1.bf16.msra.mxu1 %v2850_v19  ;;  %1887 = vmatprep.subr.bf16.mxu0 %v2876_v27 }
  0x54   :  { %2377 = vmatmul.mubr.msk.f32.gmra.mrb[38].mxu0 %vm71_vm0, %v3113_v29  ;;  %1768 = vmatprep.subr.bf16.mxu1 %v2855_v20  ;;  %v2882_v29 = vld [vmem:[%s4253_s3 + $0x244] ss:$8 sps:$4 sm:$0xff]  }
  0x55   :  { %530 = vmatprep.mubr.f32.mxu0 %v2996_v3 }
  0x56   :  { %1888 = vmatpush1.bf16.msra.mxu0 %v2874_v28  ;;  %v2997_v28 = vmov 1.0|1.0  }
  0x57   :  { %1889 = vmatprep.subr.bf16.mxu0 %v2882_v29 }
  0x58   :  { %2378 = vmatmul.mubr.msk.f32.gmra.mrb[40].mxu0 %vm71_vm0, %v3130_v33  ;;  %v2894_v33 = vld [vmem:[%s4253_s3 + $0x264] ss:$8 sps:$4 sm:$0xff]  }
  0x59   :  { %536 = vmatprep.mubr.f32.mxu0 %v2996_v3 }
  0x5a   :  { %1890 = vmatpush1.bf16.msra.mxu0 %v2880_v30 }
  0x5b   :  { %1891 = vmatprep.subr.bf16.mxu0 %v2888_v31 }
  0x5c   :  { %2379 = vmatmul.mubr.msk.f32.gmra.mrb[42].mxu0 %vm71_vm0, %v3147_v37  ;;  %v2904_v37 = vld [vmem:[%s4253_s3 + $0x280] ss:$8 sps:$4 sm:$0xff]  }
  0x5d   :  { %542 = vmatprep.mubr.f32.mxu0 %v2996_v3 }
  0x5e   :  { %1892 = vmatpush1.bf16.msra.mxu0 %v2886_v32 }
  0x5f   :  { %1893 = vmatprep.subr.bf16.mxu0 %v2894_v33 }
  0x60   :  { %2380 = vmatmul.mubr.msk.f32.gmra.mrb[44].mxu0 %vm71_vm0, %v3170_v43  ;;  %v2922_v43 = vld [vmem:[%s4253_s3 + $0x2b0] ss:$8 sps:$4 sm:$0xff]  }
  0x61   :  { %548 = vmatprep.mubr.f32.mxu0 %v2996_v3 }
  0x62   :  { %1894 = vmatpush1.bf16.msra.mxu0 %v2892_v34  ;;  %v2859_v34 = vld [vmem:[%s4253_s3 + $0x110] ss:$8 sps:$4 sm:$0xff]  }
  0x63   :  { %1895 = vmatprep.subr.bf16.mxu0 %v2900_v35  ;;  %v2867_v35 = vld [vmem:[%s4253_s3 + $0x124] ss:$8 sps:$4 sm:$0xff]  }
  0x64   :  { %2381 = vmatmul.mubr.msk.f32.gmra.mrb[46].mxu0 %vm71_vm0, %v3187_v47  ;;  %v2934_v47 = vld [vmem:[%s4253_s3 + $0x2d0] ss:$8 sps:$4 sm:$0xff]  }
  0x65   :  { %554 = vmatprep.mubr.f32.mxu0 %v2996_v3 }
  0x66   :  { %1896 = vmatpush1.bf16.msra.mxu0 %v2898_v36 }
  0x68   :  { %2382 = vmatmul.mubr.msk.f32.gmra.mrb[48].mxu0 %vm71_vm0, %v3204_v51  ;;  %v2946_v51 = vld [vmem:[%s4253_s3 + $0x2f0] ss:$8 sps:$4 sm:$0xff]  }
  0x69   :  { %560 = vmatprep.mubr.f32.mxu0 %v2996_v3 }
  0x6c   :  { %2383 = vmatmul.mubr.msk.f32.gmra.mrb[50].mxu0 %vm71_vm0, %v3221_v55  ;;  %v3502_v55 = vld [vmem:[%s4254_s2] sm:$0x3f] }
  0x6d   :  { %566 = vmatprep.mubr.f32.mxu0 %v2996_v3  ;;  %v3508_v57 = vrot.slane %v3502_v55, %v607_v54  ;;  %v3513_v58 = vrot.slane %v3502_v55, %v611_v56  ;;  %v3520_v2 = vrot.slane %v3502_v55, %v615_v60 }
  0x70   :  { %2384 = vmatmul.mubr.msk.f32.gmra.mrb[52].mxu0 %vm71_vm0, %v3238_v59 }
  0x71   :  { %572 = vmatprep.mubr.f32.mxu0 %v2996_v3 }
  0x74   :  { %2385 = vmatmul.mubr.msk.f32.gmra.mrb[54].mxu0 %vm71_vm0, %v3255_v63  ;;  %v619_v63 = vsub.s32 3, %v3496_v53 }
  0x75   :  { %578 = vmatprep.mubr.f32.mxu0 %v2996_v3 }
  0x76   :  { %v3524_v7 = vrot.slane %v3502_v55, %v619_v63 }
  0x78   :  { %2386 = vmatmul.mubr.msk.f32.gmra.mrb[56].mxu0 %vm71_vm0, %v3266_v1 }
  0x79   :  { %584 = vmatprep.mubr.f32.mxu0 %v2996_v3 }
  0x7c   :  { %2387 = vmatmul.mubr.msk.f32.gmra.mrb[58].mxu0 %vm71_vm0, %v3283_v6 }
  0x7d   :  { %590 = vmatprep.mubr.f32.mxu0 %v2996_v3 }
  0x80   :  { %2388 = vmatmul.mubr.msk.f32.gmra.mrb[60].mxu0 %vm71_vm0, %v3300_v11 }
  0x81   :  { %596 = vmatprep.mubr.f32.mxu0 %v2996_v3  ;;  %v2906_v3 = vld [vmem:[%s4253_s3 + $0x284] ss:$8 sps:$4 sm:$0xff]  }
  0x82   :  { %1897 = vmatprep.subr.bf16.mxu0 %v2906_v3 }
  0x83   :  { %1898 = vmatpush1.bf16.msra.mxu0 %v2904_v37 }
  0x84   :  { %2389 = vmatmul.mubr.msk.f32.gmra.mrb[62].mxu0 %vm71_vm0, %v3314_v14  ;;  %1899 = vmatprep.subr.bf16.mxu0 %v2912_v38 }
  0x87   :  { %1900 = vmatpush1.bf16.msra.mxu0 %v2910_v39 }
  0x88   :  { %1901 = vmatprep.subr.bf16.mxu0 %v2918_v40 }
  0x8b   :  { %1902 = vmatpush1.bf16.msra.mxu0 %v2916_v41 }
  0x8c   :  { %1903 = vmatprep.subr.bf16.mxu0 %v2924_v42 }
  0x8f   :  { %1904 = vmatpush1.bf16.msra.mxu0 %v2922_v43 }
  0x90   :  { %1905 = vmatprep.subr.bf16.mxu0 %v2930_v44 }
  0x93   :  { %1906 = vmatpush1.bf16.msra.mxu0 %v2928_v45 }
  0x94   :  { %1907 = vmatprep.subr.bf16.mxu0 %v2936_v46 }
  0x97   :  { %1908 = vmatpush1.bf16.msra.mxu0 %v2934_v47 }
  0x98   :  { %1909 = vmatprep.subr.bf16.mxu0 %v2942_v48  ;;  %v2953_v48 = vld [vmem:[%s4255_s5 + $0x50] sm:$0xff]  }
  0x9b   :  { %1910 = vmatpush1.bf16.msra.mxu0 %v2940_v49 }
  0x9c   :  { %1911 = vmatprep.subr.bf16.mxu0 %v2948_v50 }
  0x9f   :  { %1912 = vmatpush1.bf16.msra.mxu0 %v2946_v51 }
  0xdb   :  { %v186_v59 = vpop.f32.mrb[0].mxu0 }
  0xdc   :  { %v635_v61 = vsub.f32 %v186_v59, %v3508_v57  ;;  %v188_v62 = vpop.f32.mrb[1].mxu0 }
  0xdd   :  { %v636_v0 = vsub.f32 %v188_v62, %v3513_v58 }
  0xde   :  { %v731_v4 = vand.u32 2147483647, %v635_v61  ;;  %v2873_v61 = vld [vmem:[%s4253_s3 + $0x134] ss:$8 sps:$4 sm:$0xff]  }
  0xdf   :  { %v192_v1 = vpop.f32.mrb[2].mxu0  ;;  %v732_v9 = vand.u32 2147483647, %v636_v0  ;;  %v2950_v0 = vld [vmem:[%s4255_s5] sm:$0xff]  }
  0xe0   :  { %v641_v5 = vsub.f32 %v192_v1, %v3508_v57  ;;  %v194_v6 = vpop.f32.mrb[3].mxu0  ;;  %v347_v12 = vpop.f32.mrb[0].mxu1  ;;  %vm827_vm1 = vcmp.lt.f32.partialorder %v731_v4, 0.5 }
  0xe1   :  { %v642_v10 = vsub.f32 %v194_v6, %v3513_v58  ;;  %v637_v8 = vsub.f32 %v347_v12, %v3520_v2  ;;  %v349_v15 = vpop.f32.mrb[1].mxu1  ;;  %vm828_vm3 = vcmp.lt.f32.partialorder %v732_v9, 0.5 }
  0xe2   :  { %v737_v11 = vand.u32 2147483647, %v641_v5  ;;  %v638_v18 = vsub.f32 %v349_v15, %v3524_v7 }
  0xe3   :  { %v738_v13 = vand.u32 2147483647, %v642_v10  ;;  %v198_v14 = vpop.f32.mrb[4].mxu0  ;;  %v733_v23 = vand.u32 2147483647, %v637_v8 }
  0xe4   :  { %vm833_vm2 = vcmp.lt.f32.partialorder %v737_v11, 0.5  ;;  %v647_v16 = vsub.f32 %v198_v14, %v3508_v57  ;;  %v200_v17 = vpop.f32.mrb[5].mxu0  ;;  %v353_v26 = vpop.f32.mrb[2].mxu1  ;;  %v734_v29 = vand.u32 2147483647, %v638_v18 }
  0xe5   :  { %vm3530_vm4 = vmpackc.low %vm833_vm2, %vm827_vm1  ;;  %vm834_vm5 = vcmp.lt.f32.partialorder %v738_v13, 0.5  ;;  %v648_v20 = vsub.f32 %v200_v17, %v3513_v58  ;;  %v643_v30 = vsub.f32 %v353_v26, %v3520_v2  ;;  %v355_v31 = vpop.f32.mrb[3].mxu1  ;;  %vm829_vm7 = vcmp.lt.f32.partialorder %v733_v23, 0.5  ;;  %v2871_v10 = vld [vmem:[%s4253_s3 + $0x130] ss:$8 sps:$4 sm:$0xff]  }
  0xe6   :  { %vm2486_vm6 = vmpackc.low %vm834_vm5, %vm828_vm3  ;;  %v743_v24 = vand.u32 2147483647, %v647_v16  ;;  %v644_v36 = vsub.f32 %v355_v31, %v3524_v7  ;;  %vm830_vm9 = vcmp.lt.f32.partialorder %v734_v29, 0.5  ;;  %v2879_v11 = vld [vmem:[%s4253_s3 + $0x144] ss:$8 sps:$4 sm:$0xff]  }
  0xe7   :  { %v204_v27 = vpop.f32.mrb[6].mxu0  ;;  %2487 = vmatprep.mubr.msk.bf16.mxu1 %vm2486_vm6, %v2997_v28  ;;  %v744_v3 = vand.u32 2147483647, %v648_v20  ;;  %v739_v38 = vand.u32 2147483647, %v643_v30 }
  0xe8   :  { %v653_v32 = vsub.f32 %v204_v27, %v3508_v57  ;;  %v206_v33 = vpop.f32.mrb[7].mxu0  ;;  %2489 = vmatmul.mubr.msk.bf16.vlgmr.msra.gmra.mrb[32].mxu1 %vm3530_vm4, %v2997_v28  ;;  %vm839_vm8 = vcmp.lt.f32.partialorder %v743_v24, 0.5  ;;  %v740_v40 = vand.u32 2147483647, %v644_v36  ;;  %v359_v41 = vpop.f32.mrb[4].mxu1  ;;  %v2949_v27 = vld [vmem:[%s4255_s5 + $0x40] sm:$0xff]  }
  0xe9   :  { %v654_v37 = vsub.f32 %v206_v33, %v3513_v58  ;;  %1769 = vmatpush1.bf16.msra.mxu1 %v2853_v22  ;;  %vm835_vm10 = vcmp.lt.f32.partialorder %v739_v38, 0.5  ;;  %v649_v44 = vsub.f32 %v359_v41, %v3520_v2  ;;  %v361_v45 = vpop.f32.mrb[5].mxu1  ;;  %vm840_vm14 = vcmp.lt.f32.partialorder %v744_v3, 0.5  ;;  %v2877_v30 = vld [vmem:[%s4253_s3 + $0x140] ss:$8 sps:$4 sm:$0xff]   ;;  %2599 = vmatprep.subr.bf16.mxu0 %v2949_v27 }
  0xea   :  { %v749_v39 = vand.u32 2147483647, %v653_v32  ;;  %1770 = vmatprep.subr.bf16.mxu1 %v2861_v25  ;;  %vm3558_vm12 = vmpackc.low %vm835_vm10, %vm829_vm7  ;;  %vm836_vm13 = vcmp.lt.f32.partialorder %v740_v40, 0.5  ;;  %v650_v49 = vsub.f32 %v361_v45, %v3524_v7  ;;  %v2885_v33 = vld [vmem:[%s4253_s3 + $0x154] ss:$8 sps:$4 sm:$0xff]  }
  0xeb   :  { %v750_v42 = vand.u32 2147483647, %v654_v37  ;;  %v210_v43 = vpop.f32.mrb[8].mxu0  ;;  %v745_v59 = vand.u32 2147483647, %v649_v44  ;;  %vm3578_vm2 = vmpackc.low %vm836_vm13, %vm830_vm9 }
  0xec   :  { %vm845_vm11 = vcmp.lt.f32.partialorder %v749_v39, 0.5  ;;  %v659_v46 = vsub.f32 %v210_v43, %v3508_v57  ;;  %v212_v47 = vpop.f32.mrb[9].mxu0  ;;  %v365_v62 = vpop.f32.mrb[6].mxu1  ;;  %v746_v1 = vand.u32 2147483647, %v650_v49 }
  0xed   :  { %vm3564_vm15 = vmpackc.low %vm845_vm11, %vm839_vm8  ;;  %vm846_vm0 = vcmp.lt.f32.partialorder %v750_v42, 0.5  ;;  %v660_v51 = vsub.f32 %v212_v47, %v3513_v58  ;;  %1771 = vmatpush1.bf16.msra.mxu1 %v2859_v34  ;;  %v655_v4 = vsub.f32 %v365_v62, %v3520_v2  ;;  %v367_v5 = vpop.f32.mrb[7].mxu1  ;;  %vm841_vm3 = vcmp.lt.f32.partialorder %v745_v59, 0.5  ;;  %v2883_v41 = vld [vmem:[%s4253_s3 + $0x150] ss:$8 sps:$4 sm:$0xff]  }
  0xee   :  { %vm2490_vm1 = vmpackc.low %vm846_vm0, %vm840_vm14  ;;  %v755_v60 = vand.u32 2147483647, %v659_v46  ;;  %1772 = vmatprep.subr.bf16.mxu1 %v2867_v35  ;;  %v656_v12 = vsub.f32 %v367_v5, %v3524_v7  ;;  %vm842_vm5 = vcmp.lt.f32.partialorder %v746_v1, 0.5  ;;  %v2891_v42 = vld [vmem:[%s4253_s3 + $0x164] ss:$8 sps:$4 sm:$0xff]  }
  0xef   :  { %v216_v63 = vpop.f32.mrb[10].mxu0  ;;  %2491 = vmatprep.mubr.msk.bf16.mxu1 %vm2490_vm1, %v2997_v28  ;;  %v756_v13 = vand.u32 2147483647, %v660_v51  ;;  %v751_v8 = vand.u32 2147483647, %v655_v4 }
  0xf0   :  { %v665_v6 = vsub.f32 %v216_v63, %v3508_v57  ;;  %v218_v9 = vpop.f32.mrb[11].mxu0  ;;  %2493 = vmatmul.mubr.msk.bf16.gmra.mrb[36].mxu1 %vm3564_vm15, %v2997_v28  ;;  %vm851_vm4 = vcmp.lt.f32.partialorder %v755_v60, 0.5  ;;  %v752_v16 = vand.u32 2147483647, %v656_v12  ;;  %v371_v17 = vpop.f32.mrb[8].mxu1 }
  0xf1   :  { %v666_v14 = vsub.f32 %v218_v9, %v3513_v58  ;;  %1773 = vmatpush1.bf16.msra.mxu1 %v2865_v52  ;;  %vm847_vm6 = vcmp.lt.f32.partialorder %v751_v8, 0.5  ;;  %v661_v20 = vsub.f32 %v371_v17, %v3520_v2  ;;  %v373_v22 = vpop.f32.mrb[9].mxu1  ;;  %vm852_vm10 = vcmp.lt.f32.partialorder %v756_v13, 0.5  ;;  %v2921_v27 = vld [vmem:[%s4253_s3 + $0x1b4] ss:$8 sps:$4 sm:$0xff]   ;;  %v2957_v8 = vld [vmem:[%s4255_s5 + $0x60] sm:$0xff]  }
  0xf2   :  { %v761_v15 = vand.u32 2147483647, %v665_v6  ;;  %1774 = vmatprep.subr.bf16.mxu1 %v2873_v61  ;;  %vm3598_vm8 = vmpackc.low %vm847_vm6, %vm841_vm3  ;;  %vm848_vm9 = vcmp.lt.f32.partialorder %v752_v16, 0.5  ;;  %v662_v26 = vsub.f32 %v373_v22, %v3524_v7  ;;  %v2889_v6 = vld [vmem:[%s4253_s3 + $0x160] ss:$8 sps:$4 sm:$0xff]  }
  0xf3   :  { %v762_v18 = vand.u32 2147483647, %v666_v14  ;;  %v222_v19 = vpop.f32.mrb[12].mxu0  ;;  %v757_v31 = vand.u32 2147483647, %v661_v20  ;;  %vm3618_vm15 = vmpackc.low %vm848_vm9, %vm842_vm5 }
  0xf4   :  { %vm857_vm7 = vcmp.lt.f32.partialorder %v761_v15, 0.5  ;;  %v671_v23 = vsub.f32 %v222_v19, %v3508_v57  ;;  %v224_v24 = vpop.f32.mrb[13].mxu0  ;;  %v377_v34 = vpop.f32.mrb[10].mxu1  ;;  %v758_v3 = vand.u32 2147483647, %v662_v26 }
  0xf5   :  { %vm3604_vm11 = vmpackc.low %vm857_vm7, %vm851_vm4  ;;  %vm858_vm13 = vcmp.lt.f32.partialorder %v762_v18, 0.5  ;;  %v672_v29 = vsub.f32 %v224_v24, %v3513_v58  ;;  %1775 = vmatpush1.bf16.msra.mxu1 %v2871_v10  ;;  %v667_v37 = vsub.f32 %v377_v34, %v3520_v2  ;;  %v379_v38 = vpop.f32.mrb[11].mxu1  ;;  %vm853_vm0 = vcmp.lt.f32.partialorder %v757_v31, 0.5  ;;  %v2895_v14 = vld [vmem:[%s4253_s3 + $0x170] ss:$8 sps:$4 sm:$0xff]  }
  0xf6   :  { %vm2494_vm14 = vmpackc.low %vm858_vm13, %vm852_vm10  ;;  %v767_v32 = vand.u32 2147483647, %v671_v23  ;;  %1776 = vmatprep.subr.bf16.mxu1 %v2879_v11  ;;  %v668_v43 = vsub.f32 %v379_v38, %v3524_v7  ;;  %vm854_vm3 = vcmp.lt.f32.partialorder %v758_v3, 0.5  ;;  %v2897_v11 = vld [vmem:[%s4253_s3 + $0x174] ss:$8 sps:$4 sm:$0xff]  }
  0xf7   :  { %v228_v35 = vpop.f32.mrb[14].mxu0  ;;  %2495 = vmatprep.mubr.msk.bf16.mxu1 %vm2494_vm14, %v2997_v28  ;;  %v768_v44 = vand.u32 2147483647, %v672_v29  ;;  %v763_v46 = vand.u32 2147483647, %v667_v37 }
  0xf8   :  { %v677_v39 = vsub.f32 %v228_v35, %v3508_v57  ;;  %v230_v40 = vpop.f32.mrb[15].mxu0  ;;  %2497 = vmatmul.mubr.msk.bf16.gmra.mrb[40].mxu1 %vm3604_vm11, %v2997_v28  ;;  %vm863_vm1 = vcmp.lt.f32.partialorder %v767_v32, 0.5  ;;  %v764_v49 = vand.u32 2147483647, %v668_v43  ;;  %v383_v50 = vpop.f32.mrb[12].mxu1 }
  0xf9   :  { %v678_v45 = vsub.f32 %v230_v40, %v3513_v58  ;;  %1777 = vmatpush1.bf16.msra.mxu1 %v2877_v30  ;;  %vm859_vm4 = vcmp.lt.f32.partialorder %v763_v46, 0.5  ;;  %v673_v59 = vsub.f32 %v383_v50, %v3520_v2  ;;  %v385_v60 = vpop.f32.mrb[13].mxu1  ;;  %vm864_vm9 = vcmp.lt.f32.partialorder %v768_v44, 0.5  ;;  %v2903_v22 = vld [vmem:[%s4253_s3 + $0x184] ss:$8 sps:$4 sm:$0xff]  }
  0xfa   :  { %v773_v47 = vand.u32 2147483647, %v677_v39  ;;  %1778 = vmatprep.subr.bf16.mxu1 %v2885_v33  ;;  %vm3638_vm6 = vmpackc.low %vm859_vm4, %vm853_vm0  ;;  %vm860_vm7 = vcmp.lt.f32.partialorder %v764_v49, 0.5  ;;  %v674_v1 = vsub.f32 %v385_v60, %v3524_v7  ;;  %v2901_v34 = vld [vmem:[%s4253_s3 + $0x180] ss:$8 sps:$4 sm:$0xff]   ;;  %v4279_v39 = vmov 0 }
  0xfb   :  { %v774_v51 = vand.u32 2147483647, %v678_v45  ;;  %v234_v52 = vpop.f32.mrb[16].mxu0  ;;  %v769_v9 = vand.u32 2147483647, %v673_v59  ;;  %vm3661_vm14 = vmpackc.low %vm860_vm7, %vm854_vm3  ;;  %v4284_v50 = vmov 0 }
  0xfc   :  { %vm869_vm5 = vcmp.lt.f32.partialorder %v773_v47, 0.5  ;;  %v683_v61 = vsub.f32 %v234_v52, %v3508_v57  ;;  %v236_v62 = vpop.f32.mrb[17].mxu0  ;;  %v389_v12 = vpop.f32.mrb[14].mxu1  ;;  %v770_v15 = vand.u32 2147483647, %v674_v1 }
  0xfd   :  { %vm3644_vm10 = vmpackc.low %vm869_vm5, %vm863_vm1  ;;  %vm870_vm11 = vcmp.lt.f32.partialorder %v774_v51, 0.5  ;;  %v684_v5 = vsub.f32 %v236_v62, %v3513_v58  ;;  %1779 = vmatpush1.bf16.msra.mxu1 %v2883_v41  ;;  %v679_v16 = vsub.f32 %v389_v12, %v3520_v2  ;;  %v391_v17 = vpop.f32.mrb[15].mxu1  ;;  %vm865_vm0 = vcmp.lt.f32.partialorder %v769_v9, 0.5  ;;  %v2909_v45 = vld [vmem:[%s4253_s3 + $0x194] ss:$8 sps:$4 sm:$0xff]  }
  0xfe   :  { %vm2498_vm13 = vmpackc.low %vm870_vm11, %vm864_vm9  ;;  %v779_v10 = vand.u32 2147483647, %v683_v61  ;;  %1780 = vmatprep.subr.bf16.mxu1 %v2891_v42  ;;  %v680_v23 = vsub.f32 %v391_v17, %v3524_v7  ;;  %v2907_v49 = vld [vmem:[%s4253_s3 + $0x190] ss:$8 sps:$4 sm:$0xff]   ;;  %v2915_v1 = vld [vmem:[%s4253_s3 + $0x1a4] ss:$8 sps:$4 sm:$0xff]  }
  0xff   :  { %v240_v13 = vpop.f32.mrb[18].mxu0  ;;  %2499 = vmatprep.mubr.msk.bf16.mxu1 %vm2498_vm13, %v2997_v28  ;;  %v780_v18 = vand.u32 2147483647, %v684_v5  ;;  %v775_v26 = vand.u32 2147483647, %v679_v16  ;;  %v623_v41 = vsub.s32 4, %v3496_v53 }
 0x100   :  { %v689_v19 = vsub.f32 %v240_v13, %v3508_v57  ;;  %v242_v20 = vpop.f32.mrb[19].mxu0  ;;  %2501 = vmatmul.mubr.msk.bf16.gmra.mrb[44].mxu1 %vm3644_vm10, %v2997_v28  ;;  %vm875_vm1 = vcmp.lt.f32.partialorder %v779_v10, 0.5  ;;  %v776_v30 = vand.u32 2147483647, %v680_v23  ;;  %v395_v31 = vpop.f32.mrb[16].mxu1 }
 0x101   :  { %v690_v24 = vsub.f32 %v242_v20, %v3513_v58  ;;  %1781 = vmatpush1.bf16.msra.mxu1 %v2889_v6  ;;  %vm871_vm4 = vcmp.lt.f32.partialorder %v775_v26, 0.5  ;;  %v685_v35 = vsub.f32 %v395_v31, %v3520_v2  ;;  %v397_v3 = vpop.f32.mrb[17].mxu1  ;;  %vm876_vm10 = vcmp.lt.f32.partialorder %v780_v18, 0.5  ;;  %v2919_v31 = vld [vmem:[%s4253_s3 + $0x1b0] ss:$8 sps:$4 sm:$0xff]  }
 0x102   :  { %v785_v29 = vand.u32 2147483647, %v689_v19  ;;  %1782 = vmatprep.subr.bf16.mxu1 %v2897_v11  ;;  %vm3684_vm7 = vmpackc.low %vm871_vm4, %vm865_vm0  ;;  %vm872_vm9 = vcmp.lt.f32.partialorder %v776_v30, 0.5  ;;  %v686_v40 = vsub.f32 %v397_v3, %v3524_v7  ;;  %vm4283_vm0 = vcmp.lt.f32.partialorder %v770_v15, 0.5 }
 0x103   :  { %v786_v32 = vand.u32 2147483647, %v690_v24  ;;  %v246_v33 = vpop.f32.mrb[20].mxu0  ;;  %v4280_v39 = vsel %vm3684_vm7, 4294967295, %v4279_v39  ;;  %v781_v43 = vand.u32 2147483647, %v685_v35 }
 0x104   :  { %vm881_vm5 = vcmp.lt.f32.partialorder %v785_v29, 0.5  ;;  %v695_v37 = vsub.f32 %v246_v33, %v3508_v57  ;;  %v248_v38 = vpop.f32.mrb[21].mxu0  ;;  %v401_v46 = vpop.f32.mrb[18].mxu1  ;;  %v782_v51 = vand.u32 2147483647, %v686_v40  ;;  %v4286_v19 = vmov 0 }
 0x105   :  { %vm3690_vm11 = vmpackc.low %vm881_vm5, %vm875_vm1  ;;  %vm882_vm13 = vcmp.lt.f32.partialorder %v786_v32, 0.5  ;;  %v696_v42 = vsub.f32 %v248_v38, %v3513_v58  ;;  %1783 = vmatpush1.bf16.msra.mxu1 %v2895_v14  ;;  %v691_v52 = vsub.f32 %v401_v46, %v3520_v2  ;;  %v403_v59 = vpop.f32.mrb[19].mxu1  ;;  %v2913_v14 = vld [vmem:[%s4253_s3 + $0x1a0] ss:$8 sps:$4 sm:$0xff]   ;;  %v4291_v32 = vmov 0 }
 0x106   :  { %vm2502_vm3 = vmpackc.low %vm882_vm13, %vm876_vm10  ;;  %v791_v44 = vand.u32 2147483647, %v695_v37  ;;  %1784 = vmatprep.subr.bf16.mxu1 %v2903_v22  ;;  %v692_v4 = vsub.f32 %v403_v59, %v3524_v7  ;;  %v2927_v40 = vld [vmem:[%s4253_s3 + $0x1c4] ss:$8 sps:$4 sm:$0xff]   ;;  %v2925_v59 = vld [vmem:[%s4253_s3 + $0x1c0] ss:$8 sps:$4 sm:$0xff]  }
 0x107   :  { %v252_v47 = vpop.f32.mrb[22].mxu0  ;;  %2503 = vmatprep.mubr.msk.bf16.mxu1 %vm2502_vm3, %v2997_v28  ;;  %vm3704_vm1 = vmpackc.low %vm872_vm9, %vm4283_vm0  ;;  %v792_v60 = vand.u32 2147483647, %v696_v42  ;;  %vm877_vm3 = vcmp.lt.f32.partialorder %v781_v43, 0.5  ;;  %v787_v6 = vand.u32 2147483647, %v691_v52 }
 0x108   :  { %v4285_v50 = vsel %vm3704_vm1, 4294967295, %v4284_v50  ;;  %v701_v61 = vsub.f32 %v252_v47, %v3508_v57  ;;  %v254_v62 = vpop.f32.mrb[23].mxu0  ;;  %2505 = vmatmul.mubr.msk.bf16.gmra.mrb[48].mxu1 %vm3690_vm11, %v2997_v28  ;;  %vm887_vm4 = vcmp.lt.f32.partialorder %v791_v44, 0.5  ;;  %v788_v10 = vand.u32 2147483647, %v692_v4  ;;  %v407_v11 = vpop.f32.mrb[20].mxu1 }
 0x109   :  { %v702_v5 = vsub.f32 %v254_v62, %v3513_v58  ;;  %1785 = vmatpush1.bf16.msra.mxu1 %v2901_v34  ;;  %vm883_vm9 = vcmp.lt.f32.partialorder %v787_v6, 0.5  ;;  %v697_v15 = vsub.f32 %v407_v11, %v3520_v2  ;;  %v409_v16 = vpop.f32.mrb[21].mxu1  ;;  %vm888_vm0 = vcmp.lt.f32.partialorder %v792_v60, 0.5 }
 0x10a   :  { %v797_v9 = vand.u32 2147483647, %v701_v61  ;;  %1786 = vmatprep.subr.bf16.mxu1 %v2909_v45  ;;  %vm3724_vm11 = vmpackc.low %vm883_vm9, %vm877_vm3  ;;  %vm884_vm13 = vcmp.lt.f32.partialorder %v788_v10, 0.5  ;;  %v698_v20 = vsub.f32 %v409_v16, %v3524_v7  ;;  %vm4290_vm3 = vcmp.lt.f32.partialorder %v782_v51, 0.5 }
 0x10b   :  { %v798_v12 = vand.u32 2147483647, %v702_v5  ;;  %v258_v13 = vpop.f32.mrb[24].mxu0  ;;  %v4287_v19 = vsel %vm3724_vm11, 4294967295, %v4286_v19  ;;  %v793_v24 = vand.u32 2147483647, %v697_v15 }
 0x10c   :  { %vm893_vm10 = vcmp.lt.f32.partialorder %v797_v9, 0.5  ;;  %v707_v17 = vsub.f32 %v258_v13, %v3508_v57  ;;  %v260_v18 = vpop.f32.mrb[25].mxu0  ;;  %v413_v29 = vpop.f32.mrb[22].mxu1  ;;  %v794_v33 = vand.u32 2147483647, %v698_v20  ;;  %v627_v44 = vsub.s32 5, %v3496_v53 }
 0x10d   :  { %vm3730_vm7 = vmpackc.low %vm893_vm10, %vm887_vm4  ;;  %vm894_vm5 = vcmp.lt.f32.partialorder %v798_v12, 0.5  ;;  %v708_v23 = vsub.f32 %v260_v18, %v3513_v58  ;;  %1787 = vmatpush1.bf16.msra.mxu1 %v2907_v49  ;;  %v703_v34 = vsub.f32 %v413_v29, %v3520_v2  ;;  %v415_v35 = vpop.f32.mrb[23].mxu1  ;;  %v4293_v4 = vmov 0  ;;  %v2933_v12 = vld [vmem:[%s4253_s3 + $0x1d4] ss:$8 sps:$4 sm:$0xff]  }
 0x10e   :  { %vm2506_vm1 = vmpackc.low %vm894_vm5, %vm888_vm0  ;;  %v803_v26 = vand.u32 2147483647, %v707_v17  ;;  %1788 = vmatprep.subr.bf16.mxu1 %v2915_v1  ;;  %v704_v42 = vsub.f32 %v415_v35, %v3524_v7  ;;  %v2931_v15 = vld [vmem:[%s4253_s3 + $0x1d0] ss:$8 sps:$4 sm:$0xff]   ;;  %v4298_v16 = vmov 0 }
 0x10f   :  { %v264_v30 = vpop.f32.mrb[26].mxu0  ;;  %2507 = vmatprep.mubr.msk.bf16.mxu1 %vm2506_vm1, %v2997_v28  ;;  %vm3744_vm4 = vmpackc.low %vm884_vm13, %vm4290_vm3  ;;  %v804_v3 = vand.u32 2147483647, %v708_v23  ;;  %vm889_vm1 = vcmp.lt.f32.partialorder %v793_v24, 0.5  ;;  %v799_v45 = vand.u32 2147483647, %v703_v34 }
 0x110   :  { %v4292_v32 = vsel %vm3744_vm4, 4294967295, %v4291_v32  ;;  %v713_v37 = vsub.f32 %v264_v30, %v3508_v57  ;;  %v266_v38 = vpop.f32.mrb[27].mxu0  ;;  %2509 = vmatmul.mubr.msk.bf16.gmra.mrb[52].mxu1 %vm3730_vm7, %v2997_v28  ;;  %vm899_vm5 = vcmp.lt.f32.partialorder %v803_v26, 0.5  ;;  %v800_v47 = vand.u32 2147483647, %v704_v42  ;;  %v419_v49 = vpop.f32.mrb[24].mxu1 }
 0x111   :  { %v714_v43 = vsub.f32 %v266_v38, %v3513_v58  ;;  %1789 = vmatpush1.bf16.msra.mxu1 %v2913_v14  ;;  %vm895_vm9 = vcmp.lt.f32.partialorder %v799_v45, 0.5  ;;  %v709_v60 = vsub.f32 %v419_v49, %v3520_v2  ;;  %v421_v61 = vpop.f32.mrb[25].mxu1  ;;  %vm900_vm3 = vcmp.lt.f32.partialorder %v804_v3, 0.5  ;;  %v2937_v38 = vld [vmem:[%s4253_s3 + $0x1e0] ss:$8 sps:$4 sm:$0xff]  }
 0x112   :  { %v809_v46 = vand.u32 2147483647, %v713_v37  ;;  %1790 = vmatprep.subr.bf16.mxu1 %v2921_v27  ;;  %vm3766_vm13 = vmpackc.low %vm895_vm9, %vm889_vm1  ;;  %vm896_vm0 = vcmp.lt.f32.partialorder %v800_v47, 0.5  ;;  %v710_v5 = vsub.f32 %v421_v61, %v3524_v7  ;;  %vm4297_vm1 = vcmp.lt.f32.partialorder %v794_v33, 0.5  ;;  %v2939_v27 = vld [vmem:[%s4253_s3 + $0x1e4] ss:$8 sps:$4 sm:$0xff]  }
 0x113   :  { %v810_v51 = vand.u32 2147483647, %v714_v43  ;;  %v270_v52 = vpop.f32.mrb[28].mxu0  ;;  %v4294_v4 = vsel %vm3766_vm13, 4294967295, %v4293_v4  ;;  %v805_v10 = vand.u32 2147483647, %v709_v60  ;;  %v3796_v26 = vrot.slane %v3502_v55, %v623_v41 }
 0x114   :  { %vm905_vm10 = vcmp.lt.f32.partialorder %v809_v46, 0.5  ;;  %v719_v62 = vsub.f32 %v270_v52, %v3508_v57  ;;  %v272_v1 = vpop.f32.mrb[29].mxu0  ;;  %v425_v13 = vpop.f32.mrb[26].mxu1  ;;  %v806_v17 = vand.u32 2147483647, %v710_v5  ;;  %v4300_v42 = vmov 0 }
 0x115   :  { %vm3772_vm11 = vmpackc.low %vm905_vm10, %vm899_vm5  ;;  %vm906_vm7 = vcmp.lt.f32.partialorder %v810_v51, 0.5  ;;  %v720_v9 = vsub.f32 %v272_v1, %v3513_v58  ;;  %1791 = vmatpush1.bf16.msra.mxu1 %v2919_v31  ;;  %v715_v18 = vsub.f32 %v425_v13, %v3520_v2  ;;  %v427_v20 = vpop.f32.mrb[27].mxu1  ;;  %v3804_v31 = vrot.slane %v3502_v55, %v627_v44  ;;  %v2945_v49 = vld [vmem:[%s4253_s3 + $0x1f4] ss:$8 sps:$4 sm:$0xff]   ;;  %v2943_v60 = vld [vmem:[%s4253_s3 + $0x1f0] ss:$8 sps:$4 sm:$0xff]  }
 0x116   :  { %vm2510_vm4 = vmpackc.low %vm906_vm7, %vm900_vm3  ;;  %v815_v11 = vand.u32 2147483647, %v719_v62  ;;  %1792 = vmatprep.subr.bf16.mxu1 %v2927_v40  ;;  %v716_v29 = vsub.f32 %v427_v20, %v3524_v7  ;;  %v4305_v61 = vmov 0  ;;  %v2968_v44 = vld [vmem:[%s4253_s3 + $0x224] ss:$8 sps:$4 sm:$0xff]  }
 0x117   :  { %v276_v14 = vpop.f32.mrb[30].mxu0  ;;  %2511 = vmatprep.mubr.msk.bf16.mxu1 %vm2510_vm4, %v2997_v28  ;;  %vm3786_vm5 = vmpackc.low %vm896_vm0, %vm4297_vm1  ;;  %v816_v22 = vand.u32 2147483647, %v720_v9  ;;  %vm901_vm4 = vcmp.lt.f32.partialorder %v805_v10, 0.5 }
 0x118   :  { %v4299_v16 = vsel %vm3786_vm5, 4294967295, %v4298_v16  ;;  %v725_v23 = vsub.f32 %v276_v14, %v3508_v57  ;;  %v278_v24 = vpop.f32.mrb[31].mxu0  ;;  %2513 = vmatmul.mubr.msk.bf16.gmra.mrb[56].mxu1 %vm3772_vm11, %v2997_v28  ;;  %v811_v57 = vand.u32 2147483647, %v715_v18  ;;  %vm911_vm7 = vcmp.lt.f32.partialorder %v815_v11, 0.5  ;;  %v431_v35 = vpop.f32.mrb[28].mxu1 }
 0x119   :  { %v726_v30 = vsub.f32 %v278_v24, %v3513_v58  ;;  %1793 = vmatpush1.bf16.msra.mxu1 %v2925_v59  ;;  %v812_v34 = vand.u32 2147483647, %v716_v29  ;;  %v721_v58 = vsub.f32 %v431_v35, %v3520_v2  ;;  %v433_v40 = vpop.f32.mrb[29].mxu1  ;;  %vm912_vm1 = vcmp.lt.f32.partialorder %v816_v22, 0.5  ;;  %v2951_v29 = vld [vmem:[%s4255_s5 + $0x48] sm:$0xff]   ;;  %v2958_v18 = vld [vmem:[%s4255_s5 + $0x20] sm:$0xff]  }
 0x11a   :  { %v821_v33 = vand.u32 2147483647, %v725_v23  ;;  %1794 = vmatprep.subr.bf16.mxu1 %v2933_v12  ;;  %vm907_vm9 = vcmp.lt.f32.partialorder %v811_v57, 0.5  ;;  %v722_v43 = vsub.f32 %v433_v40, %v3524_v7 }
 0x11b   :  { %v822_v3 = vand.u32 2147483647, %v726_v30  ;;  %v508_v37 = vpop.f32.mrb[32].mxu0  ;;  %vm3812_vm0 = vmpackc.low %vm907_vm9, %vm901_vm4  ;;  %vm908_vm3 = vcmp.lt.f32.partialorder %v812_v34, 0.5  ;;  %v817_v46 = vand.u32 2147483647, %v721_v58 }
 0x11c   :  { %vm917_vm10 = vcmp.lt.f32.partialorder %v821_v33, 0.5  ;;  %v639_v55 = vsub.f32 %v508_v37, %v3796_v26  ;;  %v510_v41 = vpop.f32.mrb[33].mxu0  ;;  %v4301_v42 = vsel %vm3812_vm0, 4294967295, %v4300_v42  ;;  %v437_v51 = vpop.f32.mrb[30].mxu1  ;;  %vm4304_vm4 = vcmp.lt.f32.partialorder %v806_v17, 0.5 }
 0x11d   :  { %vm3818_vm13 = vmpackc.low %vm917_vm10, %vm911_vm7  ;;  %vm918_vm11 = vcmp.lt.f32.partialorder %v822_v3, 0.5  ;;  %1795 = vmatpush1.bf16.msra.mxu1 %v2931_v15  ;;  %v640_v45 = vsub.f32 %v510_v41, %v3804_v31  ;;  %v727_v62 = vsub.f32 %v437_v51, %v3520_v2  ;;  %v439_v1 = vpop.f32.mrb[31].mxu1  ;;  %v818_v9 = vand.u32 2147483647, %v722_v43  ;;  %v2965_v33 = vld [vmem:[%s4253_s3 + $0x200] ss:$8 sps:$4 sm:$0xff]  }
 0x11e   :  { %vm2514_vm5 = vmpackc.low %vm918_vm11, %vm912_vm1  ;;  %v735_v47 = vand.u32 2147483647, %v639_v55  ;;  %1796 = vmatprep.subr.bf16.mxu1 %v2939_v27  ;;  %v728_v10 = vsub.f32 %v439_v1, %v3524_v7  ;;  %vm913_vm11 = vcmp.lt.f32.partialorder %v817_v46, 0.5  ;;  %v2966_v3 = vld [vmem:[%s4253_s3 + $0x214] ss:$8 sps:$4 sm:$0xff]  }
 0x11f   :  { %2515 = vmatprep.mubr.msk.bf16.mxu1 %vm2514_vm5, %v2997_v28  ;;  %v736_v52 = vand.u32 2147483647, %v640_v45  ;;  %v514_v59 = vpop.f32.mrb[34].mxu0  ;;  %vm3832_vm7 = vmpackc.low %vm908_vm3, %vm4304_vm4  ;;  %v823_v2 = vand.u32 2147483647, %v727_v62  ;;  %vm914_vm3 = vcmp.lt.f32.partialorder %v818_v9, 0.5 }
 0x120   :  { %v4306_v61 = vsel %vm3832_vm7, 4294967295, %v4305_v61  ;;  %2517 = vmatmul.mubr.msk.bf16.gmra.mrb[60].mxu1 %vm3818_vm13, %v2997_v28  ;;  %v645_v5 = vsub.f32 %v514_v59, %v3796_v26  ;;  %v516_v6 = vpop.f32.mrb[35].mxu0  ;;  %vm831_vm5 = vcmp.lt.f32.partialorder %v735_v47, 0.5  ;;  %v824_v13 = vand.u32 2147483647, %v728_v10  ;;  %v2954_v45 = vld [vmem:[%s4255_s5 + $0x10] sm:$0xff]  }
 0x121   :  { %1797 = vmatpush1.bf16.msra.mxu1 %v2937_v38  ;;  %v646_v11 = vsub.f32 %v516_v6, %v3804_v31  ;;  %2519 = vmatprep.mubr.msk.bf16.mxu1 %vm3578_vm2, %v2997_v28  ;;  %vm919_vm9 = vcmp.lt.f32.partialorder %v823_v2, 0.5  ;;  %vm4309_vm0 = vcmp.lt.f32.partialorder %v736_v52, 0.5  ;;  %v2967_v55 = vld [vmem:[%s4253_s3 + $0x210] ss:$8 sps:$4 sm:$0xff]   ;;  %v2969_v59 = vld [vmem:[%s4253_s3 + $0x220] ss:$8 sps:$4 sm:$0xff]  }
 0x122   :  { %v741_v12 = vand.u32 2147483647, %v645_v5  ;;  %1798 = vmatprep.subr.bf16.mxu1 %v2945_v49  ;;  %vm3847_vm1 = vmpackc.low %vm919_vm9, %vm913_vm11  ;;  %vm920_vm4 = vcmp.lt.f32.partialorder %v824_v13, 0.5  ;;  %v2955_v49 = vld [vmem:[%s4255_s5 + $0x58] sm:$0xff]  }
 0x123   :  { %v742_v14 = vand.u32 2147483647, %v646_v11  ;;  %v520_v15 = vpop.f32.mrb[36].mxu0  ;;  %vm3859_vm11 = vmpackc.low %vm920_vm4, %vm914_vm3  ;;  %v2970_v62 = vld [vmem:[%s4253_s3 + $0x234] ss:$8 sps:$4 sm:$0xff]  }
 0x124   :  { %vm837_vm10 = vcmp.lt.f32.partialorder %v741_v12, 0.5  ;;  %v651_v7 = vsub.f32 %v520_v15, %v3796_v26  ;;  %v522_v17 = vpop.f32.mrb[37].mxu0  ;;  %v2956_v1 = vld [vmem:[%s4255_s5 + $0x18] sm:$0xff]  }
 0x125   :  { %vm2552_vm2 = vmpackc.low %vm837_vm10, %vm831_vm5  ;;  %vm838_vm13 = vcmp.lt.f32.partialorder %v742_v14, 0.5  ;;  %1799 = vmatpush1.bf16.msra.mxu1 %v2943_v60  ;;  %v652_v20 = vsub.f32 %v522_v17, %v3804_v31  ;;  %v2971_v2 = vld [vmem:[%s4253_s3 + $0x230] ss:$8 sps:$4 sm:$0xff]   ;;  %v2972_v14 = vld [vmem:[%s4253_s3 + $0x244] ss:$8 sps:$4 sm:$0xff]  }
 0x126   :  { %vm2550_vm7 = vmpackc.low %vm838_vm13, %vm4309_vm0  ;;  %v747_v22 = vand.u32 2147483647, %v651_v7  ;;  %2675 = vmatprep.subr.bf16.mxu1 %v3379_v21  ;;  %v2952_v21 = vld [vmem:[%s4255_s5 + $0x8] sm:$0xff]  }
 0x127   :  { %v748_v23 = vand.u32 2147483647, %v652_v20  ;;  %v526_v24 = vpop.f32.mrb[38].mxu0  ;;  %2551 = vmatprep.mubr.msk.bf16.mxu0 %vm2550_vm7, %v2997_v28  ;;  %v2973_v20 = vld [vmem:[%s4253_s3 + $0x240] ss:$8 sps:$4 sm:$0xff]  }
 0x128   :  { %2521 = vmatmul.mubr.msk.bf16.vlgmr.msra.gmra.mrb[32].mxu1 %vm3558_vm12, %v2997_v28  ;;  %v657_v30 = vsub.f32 %v526_v24, %v3796_v26  ;;  %v528_v57 = vpop.f32.mrb[39].mxu0  ;;  %2553 = vmatmul.mubr.msk.bf16.vlgmr.msra.gmra.mrb[64].mxu0 %vm2552_vm2, %v2997_v28  ;;  %vm843_vm0 = vcmp.lt.f32.partialorder %v747_v22, 0.5  ;;  %vm4316_vm2 = vnez %v4285_v50  ;;  %v2975_v50 = vld [vmem:[%s4253_s3 + $0x250] ss:$8 sps:$4 sm:$0xff]  }
 0x129   :  { %2691 = vmatpush1.bf16.msra.mxu1 %v2965_v33  ;;  %v658_v34 = vsub.f32 %v528_v57, %v3804_v31  ;;  %2523 = vmatprep.mubr.msk.bf16.mxu1 %vm3618_vm15, %v2997_v28  ;;  %vm844_vm12 = vcmp.lt.f32.partialorder %v748_v23, 0.5  ;;  %v2974_v23 = vld [vmem:[%s4253_s3 + $0x254] ss:$8 sps:$4 sm:$0xff]   ;;  %v2976_v33 = vld [vmem:[%s4253_s3 + $0x264] ss:$8 sps:$4 sm:$0xff]  }
 0x12a   :  { %v753_v35 = vand.u32 2147483647, %v657_v30  ;;  %2676 = vmatprep.subr.bf16.mxu1 %v2966_v3  ;;  %2600 = vmatpush3.bf16.msra.mxu0 %v2950_v0 }
 0x12b   :  { %v754_v37 = vand.u32 2147483647, %v658_v34  ;;  %v532_v38 = vpop.f32.mrb[40].mxu0  ;;  %2601 = vmatprep.subr.bf16.mxu0 %v2951_v29 }
 0x12c   :  { %vm849_vm7 = vcmp.lt.f32.partialorder %v753_v35, 0.5  ;;  %v663_v58 = vsub.f32 %v532_v38, %v3796_v26  ;;  %v534_v36 = vpop.f32.mrb[41].mxu0  ;;  %v2977_v38 = vld [vmem:[%s4253_s3 + $0x260] ss:$8 sps:$4 sm:$0xff]  }
 0x12d   :  { %vm3889_vm15 = vmpackc.low %vm849_vm7, %vm843_vm0  ;;  %vm850_vm5 = vcmp.lt.f32.partialorder %v754_v37, 0.5  ;;  %2692 = vmatpush1.bf16.msra.mxu1 %v2967_v55  ;;  %v664_v41 = vsub.f32 %v534_v36, %v3804_v31 }
 0x12e   :  { %vm2554_vm13 = vmpackc.low %vm850_vm5, %vm844_vm12  ;;  %v759_v43 = vand.u32 2147483647, %v663_v58  ;;  %2677 = vmatprep.subr.bf16.mxu1 %v2968_v44  ;;  %2602 = vmatpush3.bf16.msra.mxu0 %v2952_v21  ;;  %v2962_v44 = vld [vmem:[%s4255_s5 + $0x30] sm:$0xff]  }
 0x12f   :  { %v760_v46 = vand.u32 2147483647, %v664_v41  ;;  %v538_v47 = vpop.f32.mrb[42].mxu0  ;;  %2555 = vmatprep.mubr.msk.bf16.mxu0 %vm2554_vm13, %v2997_v28  ;;  %2603 = vmatprep.subr.bf16.mxu0 %v2953_v48  ;;  %vm4317_vm13 = vnez %v4280_v39  ;;  %v2978_v39 = vld [vmem:[%s4253_s3 + $0x274] ss:$8 sps:$4 sm:$0xff]  }
 0x130   :  { %2525 = vmatmul.mubr.msk.bf16.gmra.mrb[36].mxu1 %vm3598_vm8, %v2997_v28  ;;  %v669_v51 = vsub.f32 %v538_v47, %v3796_v26  ;;  %v540_v52 = vpop.f32.mrb[43].mxu0  ;;  %2557 = vmatmul.mubr.msk.bf16.gmra.mrb[68].mxu0 %vm3889_vm15, %v2997_v28  ;;  %vm855_vm9 = vcmp.lt.f32.partialorder %v759_v43, 0.5 }
 0x131   :  { %2693 = vmatpush1.bf16.msra.mxu1 %v2969_v59  ;;  %v670_v60 = vsub.f32 %v540_v52, %v3804_v31  ;;  %2527 = vmatprep.mubr.msk.bf16.mxu1 %vm3661_vm14, %v2997_v28  ;;  %vm856_vm8 = vcmp.lt.f32.partialorder %v760_v46, 0.5  ;;  %v2980_v46 = vld [vmem:[%s4253_s3 + $0x284] ss:$8 sps:$4 sm:$0xff]  }
 0x132   :  { %v765_v25 = vand.u32 2147483647, %v669_v51  ;;  %2678 = vmatprep.subr.bf16.mxu1 %v2970_v62  ;;  %2604 = vmatpush3.bf16.msra.mxu0 %v2954_v45 }
 0x133   :  { %v766_v5 = vand.u32 2147483647, %v670_v60  ;;  %v544_v6 = vpop.f32.mrb[44].mxu0  ;;  %2605 = vmatprep.subr.bf16.mxu0 %v2955_v49 }
 0x134   :  { %vm861_vm14 = vcmp.lt.f32.partialorder %v765_v25, 0.5  ;;  %v675_v9 = vsub.f32 %v544_v6, %v3796_v26  ;;  %v546_v10 = vpop.f32.mrb[45].mxu0  ;;  %v2981_v25 = vld [vmem:[%s4253_s3 + $0x280] ss:$8 sps:$4 sm:$0xff]  }
 0x135   :  { %vm3931_vm10 = vmpackc.low %vm861_vm14, %vm855_vm9  ;;  %vm862_vm3 = vcmp.lt.f32.partialorder %v766_v5, 0.5  ;;  %2694 = vmatpush1.bf16.msra.mxu1 %v2971_v2  ;;  %v676_v12 = vsub.f32 %v546_v10, %v3804_v31  ;;  %vm4318_vm9 = vnez %v4292_v32  ;;  %v2979_v32 = vld [vmem:[%s4253_s3 + $0x270] ss:$8 sps:$4 sm:$0xff]   ;;  %v2984_v2 = vld [vmem:[%s4253_s3 + $0x2a4] ss:$8 sps:$4 sm:$0xff]  }
 0x136   :  { %vm2558_vm4 = vmpackc.low %vm862_vm3, %vm856_vm8  ;;  %v771_v13 = vand.u32 2147483647, %v675_v9  ;;  %2679 = vmatprep.subr.bf16.mxu1 %v2972_v14  ;;  %2606 = vmatpush3.bf16.msra.mxu0 %v2956_v1  ;;  %v2982_v1 = vld [vmem:[%s4253_s3 + $0x294] ss:$8 sps:$4 sm:$0xff]  }
 0x137   :  { %v772_v15 = vand.u32 2147483647, %v676_v12  ;;  %v550_v7 = vpop.f32.mrb[46].mxu0  ;;  %2559 = vmatprep.mubr.msk.bf16.mxu0 %vm2558_vm4, %v2997_v28  ;;  %2607 = vmatprep.subr.bf16.mxu0 %v2957_v8 }
 0x138   :  { %2529 = vmatmul.mubr.msk.bf16.gmra.mrb[40].mxu1 %vm3638_vm6, %v2997_v28  ;;  %v681_v17 = vsub.f32 %v550_v7, %v3796_v26  ;;  %v552_v0 = vpop.f32.mrb[47].mxu0  ;;  %2561 = vmatmul.mubr.msk.bf16.gmra.mrb[72].mxu0 %vm3931_vm10, %v2997_v28  ;;  %vm867_vm0 = vcmp.lt.f32.partialorder %v771_v13, 0.5 }
 0x139   :  { %2695 = vmatpush1.bf16.msra.mxu1 %v2973_v20  ;;  %v682_v22 = vsub.f32 %v552_v0, %v3804_v31  ;;  %2531 = vmatprep.mubr.msk.bf16.mxu1 %vm4316_vm2, %v2997_v28  ;;  %vm868_vm6 = vcmp.lt.f32.partialorder %v772_v15, 0.5  ;;  %v2985_v0 = vld [vmem:[%s4253_s3 + $0x2a0] ss:$8 sps:$4 sm:$0xff]  }
 0x13a   :  { %v777_v63 = vand.u32 2147483647, %v681_v17  ;;  %2680 = vmatprep.subr.bf16.mxu1 %v2974_v23  ;;  %2608 = vmatpush3.bf16.msra.mxu0 %v2958_v18 }
 0x13b   :  { %v778_v24 = vand.u32 2147483647, %v682_v22  ;;  %v556_v29 = vpop.f32.mrb[48].mxu0  ;;  %v2986_v22 = vld [vmem:[%s4253_s3 + $0x2b4] ss:$8 sps:$4 sm:$0xff]  }
 0x13c   :  { %vm873_vm12 = vcmp.lt.f32.partialorder %v777_v63, 0.5  ;;  %v687_v30 = vsub.f32 %v556_v29, %v3796_v26  ;;  %v558_v57 = vpop.f32.mrb[49].mxu0 }
 0x13d   :  { %vm2564_vm7 = vmpackc.low %vm873_vm12, %vm867_vm0  ;;  %vm874_vm15 = vcmp.lt.f32.partialorder %v778_v24, 0.5  ;;  %2696 = vmatpush1.bf16.msra.mxu1 %v2975_v50  ;;  %v688_v21 = vsub.f32 %v558_v57, %v3804_v31  ;;  %vm4323_vm0 = vnez %v4287_v19  ;;  %v2988_v50 = vld [vmem:[%s4253_s3 + $0x2c4] ss:$8 sps:$4 sm:$0xff]  }
 0x13e   :  { %vm2562_vm5 = vmpackc.low %vm874_vm15, %vm868_vm6  ;;  %2681 = vmatprep.subr.bf16.mxu1 %v2976_v33  ;;  %v783_v34 = vand.u32 2147483647, %v687_v30  ;;  %vm4324_vm6 = vnez %v4299_v16  ;;  %v2983_v16 = vld [vmem:[%s4253_s3 + $0x290] ss:$8 sps:$4 sm:$0xff]  }
 0x13f   :  { %2563 = vmatprep.mubr.msk.bf16.mxu0 %vm2562_vm5, %v2997_v28  ;;  %v784_v48 = vand.u32 2147483647, %v688_v21  ;;  %v562_v35 = vpop.f32.mrb[50].mxu0 }
 0x140   :  { %2533 = vmatmul.mubr.msk.bf16.gmra.mrb[44].mxu1 %vm4317_vm13, %v2997_v28  ;;  %2565 = vmatmul.mubr.msk.bf16.gmra.mrb[76].mxu0 %vm2564_vm7, %v2997_v28  ;;  %v693_v3 = vsub.f32 %v562_v35, %v3796_v26  ;;  %v564_v37 = vpop.f32.mrb[51].mxu0  ;;  %vm879_vm8 = vcmp.lt.f32.partialorder %v783_v34, 0.5 }
 0x141   :  { %2697 = vmatpush1.bf16.msra.mxu1 %v2977_v38  ;;  %2535 = vmatprep.mubr.msk.bf16.mxu1 %vm4318_vm9, %v2997_v28  ;;  %v694_v58 = vsub.f32 %v564_v37, %v3804_v31  ;;  %vm880_vm14 = vcmp.lt.f32.partialorder %v784_v48, 0.5  ;;  %v2989_v37 = vld [vmem:[%s4253_s3 + $0x2c0] ss:$8 sps:$4 sm:$0xff]  }
 0x142   :  { %2682 = vmatprep.subr.bf16.mxu1 %v2978_v39  ;;  %v789_v36 = vand.u32 2147483647, %v693_v3  ;;  %v2991_v39 = vld [vmem:[%s4253_s3 + $0x2d0] ss:$8 sps:$4 sm:$0xff]  }
 0x143   :  { %v790_v40 = vand.u32 2147483647, %v694_v58  ;;  %v568_v55 = vpop.f32.mrb[52].mxu0  ;;  %v2990_v58 = vld [vmem:[%s4253_s3 + $0x2d4] ss:$8 sps:$4 sm:$0xff]  }
 0x144   :  { %vm885_vm10 = vcmp.lt.f32.partialorder %v789_v36, 0.5  ;;  %v699_v41 = vsub.f32 %v568_v55, %v3796_v26  ;;  %v570_v43 = vpop.f32.mrb[53].mxu0  ;;  %v2993_v36 = vld [vmem:[%s4253_s3 + $0x2e0] ss:$8 sps:$4 sm:$0xff]   ;;  %v2995_v55 = vld [vmem:[%s4253_s3 + $0x2f0] ss:$8 sps:$4 sm:$0xff]  }
 0x145   :  { %2698 = vmatpush1.bf16.msra.mxu1 %v2979_v32  ;;  %vm3988_vm3 = vmpackc.low %vm885_vm10, %vm879_vm8  ;;  %vm886_vm4 = vcmp.lt.f32.partialorder %v790_v40, 0.5  ;;  %v700_v45 = vsub.f32 %v570_v43, %v3804_v31  ;;  %vm4329_vm8 = vnez %v4294_v4  ;;  %v2994_v40 = vld [vmem:[%s4253_s3 + $0x2f4] ss:$8 sps:$4 sm:$0xff]   ;;  %v2960_v43 = vld [vmem:[%s4255_s5 + $0x28] sm:$0xff]  }
 0x146   :  { %2683 = vmatprep.subr.bf16.mxu1 %v2980_v46  ;;  %vm3996_vm2 = vmpackc.low %vm886_vm4, %vm880_vm14  ;;  %v795_v49 = vand.u32 2147483647, %v699_v41  ;;  %vm4330_vm14 = vnez %v4306_v61  ;;  %v2987_v61 = vld [vmem:[%s4253_s3 + $0x2b0] ss:$8 sps:$4 sm:$0xff]   ;;  %v2959_v41 = vld [vmem:[%s4255_s5 + $0x68] sm:$0xff]  }
 0x147   :  { %v796_v51 = vand.u32 2147483647, %v700_v45  ;;  %v574_v52 = vpop.f32.mrb[54].mxu0  ;;  %2609 = vmatprep.subr.bf16.mxu0 %v2959_v41  ;;  %v2961_v32 = vld [vmem:[%s4255_s5 + $0x70] sm:$0xff]   ;;  %v2963_v45 = vld [vmem:[%s4255_s5 + $0x78] sm:$0xff]  }
 0x148   :  { %2537 = vmatmul.mubr.msk.bf16.gmra.mrb[48].mxu1 %vm4323_vm0, %v2997_v28  ;;  %v705_v59 = vsub.f32 %v574_v52, %v3796_v26  ;;  %v576_v60 = vpop.f32.mrb[55].mxu0  ;;  %vm891_vm12 = vcmp.lt.f32.partialorder %v795_v49, 0.5  ;;  %2610 = vmatpush3.bf16.msra.mxu0 %v2960_v43  ;;  %v2964_v46 = vld [vmem:[%s4255_s5 + $0x38] sm:$0xff]  }
 0x149   :  { %2699 = vmatpush1.bf16.msra.mxu1 %v2981_v25  ;;  %2539 = vmatprep.mubr.msk.bf16.mxu1 %vm4324_vm6, %v2997_v28  ;;  %v706_v62 = vsub.f32 %v576_v60, %v3804_v31  ;;  %vm892_vm7 = vcmp.lt.f32.partialorder %v796_v51, 0.5 }
 0x14a   :  { %2684 = vmatprep.subr.bf16.mxu1 %v2982_v1  ;;  %v801_v19 = vand.u32 2147483647, %v705_v59  ;;  %2611 = vmatprep.subr.bf16.mxu0 %v2961_v32 }
 0x14b   :  { %v802_v5 = vand.u32 2147483647, %v706_v62  ;;  %v580_v6 = vpop.f32.mrb[56].mxu0 }
 0x14c   :  { %vm897_vm15 = vcmp.lt.f32.partialorder %v801_v19, 0.5  ;;  %v711_v8 = vsub.f32 %v580_v6, %v3796_v26  ;;  %v582_v9 = vpop.f32.mrb[57].mxu0  ;;  %2612 = vmatpush3.bf16.msra.mxu0 %v2962_v44 }
 0x14d   :  { %2700 = vmatpush1.bf16.msra.mxu1 %v2983_v16  ;;  %vm4018_vm5 = vmpackc.low %vm897_vm15, %vm891_vm12  ;;  %vm898_vm13 = vcmp.lt.f32.partialorder %v802_v5, 0.5  ;;  %v712_v11 = vsub.f32 %v582_v9, %v3804_v31  ;;  %vm4335_vm15 = vnez %v4301_v42  ;;  %2613 = vmatprep.subr.bf16.mxu0 %v2963_v45 }
 0x14e   :  { %2685 = vmatprep.subr.bf16.mxu1 %v2984_v2  ;;  %vm4026_vm9 = vmpackc.low %vm898_vm13, %vm892_vm7  ;;  %v807_v13 = vand.u32 2147483647, %v711_v8 }
 0x14f   :  { %v808_v14 = vand.u32 2147483647, %v712_v11  ;;  %v586_v15 = vpop.f32.mrb[58].mxu0 }
 0x150   :  { %2541 = vmatmul.mubr.msk.bf16.gmra.mrb[52].mxu1 %vm4329_vm8, %v2997_v28  ;;  %v717_v7 = vsub.f32 %v586_v15, %v3796_v26  ;;  %v588_v17 = vpop.f32.mrb[59].mxu0  ;;  %vm903_vm10 = vcmp.lt.f32.partialorder %v807_v13, 0.5  ;;  %2614 = vmatpush3.bf16.msra.mxu0 %v2964_v46 }
 0x151   :  { %2701 = vmatpush1.bf16.msra.mxu1 %v2985_v0  ;;  %2543 = vmatprep.mubr.msk.bf16.mxu1 %vm4330_vm14, %v2997_v28  ;;  %v718_v20 = vsub.f32 %v588_v17, %v3804_v31  ;;  %vm904_vm4 = vcmp.lt.f32.partialorder %v808_v14, 0.5 }
 0x152   :  { %2686 = vmatprep.subr.bf16.mxu1 %v2986_v22  ;;  %v813_v4 = vand.u32 2147483647, %v717_v7 }
 0x153   :  { %v814_v63 = vand.u32 2147483647, %v718_v20  ;;  %v592_v23 = vpop.f32.mrb[60].mxu0 }
 0x154   :  { %vm909_vm0 = vcmp.lt.f32.partialorder %v813_v4, 0.5  ;;  %v723_v24 = vsub.f32 %v592_v23, %v3796_v26  ;;  %v594_v29 = vpop.f32.mrb[61].mxu0 }
 0x155   :  { %2702 = vmatpush1.bf16.msra.mxu1 %v2987_v61  ;;  %vm4048_vm6 = vmpackc.low %vm909_vm0, %vm903_vm10  ;;  %vm910_vm12 = vcmp.lt.f32.partialorder %v814_v63, 0.5  ;;  %v724_v57 = vsub.f32 %v594_v29, %v3804_v31 }
 0x156   :  { %2687 = vmatprep.subr.bf16.mxu1 %v2988_v50  ;;  %vm4056_vm7 = vmpackc.low %vm910_vm12, %vm904_vm4  ;;  %v819_v33 = vand.u32 2147483647, %v723_v24 }
 0x157   :  { %v820_v34 = vand.u32 2147483647, %v724_v57  ;;  %v598_v48 = vpop.f32.mrb[62].mxu0 }
 0x158   :  { %2545 = vmatmul.mubr.msk.bf16.gmra.mrb[56].mxu1 %vm4335_vm15, %v2997_v28  ;;  %v729_v35 = vsub.f32 %v598_v48, %v3796_v26  ;;  %v600_v3 = vpop.f32.mrb[63].mxu0  ;;  %vm915_vm13 = vcmp.lt.f32.partialorder %v819_v33, 0.5 }
 0x159   :  { %2703 = vmatpush1.bf16.msra.mxu1 %v2989_v37  ;;  %2547 = vmatprep.mubr.msk.bf16.mxu1 %vm3859_vm11, %v2997_v28  ;;  %v730_v38 = vsub.f32 %v600_v3, %v3804_v31  ;;  %vm916_vm8 = vcmp.lt.f32.partialorder %v820_v34, 0.5  ;;  %v2992_v31 = vld [vmem:[%s4253_s3 + $0x2e4] ss:$8 sps:$4 sm:$0xff]  }
 0x15a   :  { %2688 = vmatprep.subr.bf16.mxu1 %v2990_v58  ;;  %v825_v42 = vand.u32 2147483647, %v729_v35 }
 0x15b   :  { %v826_v26 = vand.u32 2147483647, %v730_v38 }
 0x15c   :  { %vm921_vm14 = vcmp.lt.f32.partialorder %v825_v42, 0.5 }
 0x15d   :  { %2704 = vmatpush1.bf16.msra.mxu1 %v2991_v39  ;;  %vm4077_vm10 = vmpackc.low %vm921_vm14, %vm915_vm13  ;;  %vm922_vm11 = vcmp.lt.f32.partialorder %v826_v26, 0.5 }
 0x15e   :  { %2689 = vmatprep.subr.bf16.mxu1 %v2992_v31  ;;  %vm2578_vm4 = vmpackc.low %vm922_vm11, %vm916_vm8 }
 0x160   :  { %2549 = vmatmul.mubr.msk.bf16.gmra.mrb[60].mxu1 %vm3847_vm1, %v2997_v28 }
 0x161   :  { %2705 = vmatpush1.bf16.msra.mxu1 %v2993_v36  ;;  %2567 = vmatprep.mubr.msk.bf16.mxu1 %vm3996_vm2, %v2997_v28 }
 0x162   :  { %2690 = vmatprep.subr.bf16.mxu1 %v2994_v40 }
 0x165   :  { %2706 = vmatpush1.bf16.msra.mxu1 %v2995_v55 }
 0x168   :  { %2569 = vmatmul.mubr.msk.bf16.vlgmr.msra.gmra.mrb[48].mxu1 %vm3988_vm3, %v2997_v28 }
 0x169   :  { %2571 = vmatprep.mubr.msk.bf16.mxu1 %vm4026_vm9, %v2997_v28 }
 0x170   :  { %2573 = vmatmul.mubr.msk.bf16.gmra.mrb[52].mxu1 %vm4018_vm5, %v2997_v28 }
 0x171   :  { %2575 = vmatprep.mubr.msk.bf16.mxu1 %vm4056_vm7, %v2997_v28 }
 0x178   :  { %2577 = vmatmul.mubr.msk.bf16.gmra.mrb[56].mxu1 %vm4048_vm6, %v2997_v28 }
 0x179   :  { %2579 = vmatprep.mubr.msk.bf16.mxu1 %vm2578_vm4, %v2997_v28 }
 0x180   :  { %2581 = vmatmul.mubr.msk.bf16.gmra.mrb[60].mxu1 %vm4077_vm10, %v2997_v28  ;;  %v1163_v28 = vld [vmem:[%s4256_s4] sm:$0x3] }
 0x181   :  { %v4144_v47 = vrot.slane %v1163_v28, %v607_v54  ;;  %v4148_v49 = vrot.slane %v1163_v28, %v611_v56 }
 0x1fb   :  { %v1802_v51 = vpop.f32.mrb[32].mxu1  ;;  %v1915_v52 = vpop.f32.mrb[64].mxu0 }
 0x1fc   :  { %v2707_v59 = vadd.f32 %v1802_v51, %v4144_v47  ;;  %v1804_v60 = vpop.f32.mrb[33].mxu1  ;;  %v1917_v25 = vpop.f32.mrb[65].mxu0 }
 0x1fd   :  { %v2709_v62 = vadd.f32 %v1804_v60, %v4148_v49  ;;  %v1806_v1 = vpop.f32.mrb[34].mxu1  ;;  %v1919_v19 = vpop.f32.mrb[66].mxu0 }
 0x1fe   :  { %v2711_v5 = vadd.f32 %v1806_v1, %v4144_v47  ;;  %v2708_v6 = vadd.f32 %v2707_v59, %v1915_v52  ;;  %v1808_v8 = vpop.f32.mrb[35].mxu1  ;;  %v1921_v54 = vpop.f32.mrb[67].mxu0 }
 0x1ff   :  { %v2713_v9 = vadd.f32 %v1808_v8, %v4148_v49  ;;  %v2710_v53 = vadd.f32 %v2709_v62, %v1917_v25 }
 0x200   :  { %v1994_v56 = vmul.f32 %v2708_v6, %v2708_v6  ;;  %v2712_v16 = vadd.f32 %v2711_v5, %v1919_v19 }
 0x201   :  { %v1995_v10 = vmul.f32 %v2710_v53, %v2710_v53  ;;  %v2714_v11 = vadd.f32 %v2713_v9, %v1921_v54 }
 0x202   :  { %v1996_v2 = vmul.f32 %v2712_v16, %v2712_v16  ;;  %v2026_v15 = vmul.f32 %v2708_v6, %v1994_v56 }
 0x203   :  { %v1997_v12 = vmul.f32 %v2714_v11, %v2714_v11  ;;  %v1812_v13 = vpop.f32.mrb[36].mxu1  ;;  %v1925_v14 = vpop.f32.mrb[68].mxu0  ;;  %v2027_v22 = vmul.f32 %v2710_v53, %v1995_v10 }
 0x204   :  { %v2028_v7 = vmul.f32 %v2712_v16, %v1996_v2  ;;  %v2715_v17 = vadd.f32 %v1812_v13, %v4144_v47  ;;  %v1814_v0 = vpop.f32.mrb[37].mxu1  ;;  %v1927_v20 = vpop.f32.mrb[69].mxu0 }
 0x205   :  { %v2029_v4 = vmul.f32 %v2714_v11, %v1997_v12  ;;  %v2717_v63 = vadd.f32 %v1814_v0, %v4148_v49  ;;  %v1816_v23 = vpop.f32.mrb[38].mxu1  ;;  %v1929_v24 = vpop.f32.mrb[70].mxu0 }
 0x206   :  { %v2058_v29 = vpack.c.bf16 %v2028_v7, %v2026_v15  ;;  %v2719_v61 = vadd.f32 %v1816_v23, %v4144_v47  ;;  %v2716_v30 = vadd.f32 %v2715_v17, %v1925_v14  ;;  %v1818_v57 = vpop.f32.mrb[39].mxu1  ;;  %v1931_v50 = vpop.f32.mrb[71].mxu0 }
 0x207   :  { %v2721_v21 = vadd.f32 %v1818_v57, %v4148_v49  ;;  %v2718_v33 = vadd.f32 %v2717_v63, %v1927_v20  ;;  %v2059_v34 = vpack.c.bf16 %v2029_v4, %v2027_v22 }
 0x208   :  { %v1998_v48 = vmul.f32 %v2716_v30, %v2716_v30  ;;  %v2720_v35 = vadd.f32 %v2719_v61, %v1929_v24 }
 0x209   :  { %v1999_v3 = vmul.f32 %v2718_v33, %v2718_v33  ;;  %v2722_v37 = vadd.f32 %v2721_v21, %v1931_v50  ;;  %2241 = vmatprep.mubr.bf16.mxu0 %v2059_v34 }
 0x20a   :  { %v2000_v38 = vmul.f32 %v2720_v35, %v2720_v35  ;;  %2242 = vmatmul.mubr.bf16.vlgmr.msra.gmra.mrb[80].mxu0 %v2058_v29  ;;  %v2030_v39 = vmul.f32 %v2716_v30, %v1998_v48 }
 0x20b   :  { %v2001_v58 = vmul.f32 %v2722_v37, %v2722_v37  ;;  %v1822_v42 = vpop.f32.mrb[40].mxu1  ;;  %v1935_v26 = vpop.f32.mrb[72].mxu0  ;;  %v2031_v55 = vmul.f32 %v2718_v33, %v1999_v3 }
 0x20c   :  { %v2032_v27 = vmul.f32 %v2720_v35, %v2000_v38  ;;  %v2723_v31 = vadd.f32 %v1822_v42, %v4144_v47  ;;  %v1824_v36 = vpop.f32.mrb[41].mxu1  ;;  %v1937_v40 = vpop.f32.mrb[73].mxu0 }
 0x20d   :  { %v2033_v18 = vmul.f32 %v2722_v37, %v2001_v58  ;;  %v2725_v41 = vadd.f32 %v1824_v36, %v4148_v49  ;;  %v1826_v43 = vpop.f32.mrb[42].mxu1  ;;  %v1939_v32 = vpop.f32.mrb[74].mxu0 }
 0x20e   :  { %v2727_v44 = vadd.f32 %v1826_v43, %v4144_v47  ;;  %v2724_v45 = vadd.f32 %v2723_v31, %v1935_v26  ;;  %v1828_v46 = vpop.f32.mrb[43].mxu1  ;;  %v1941_v28 = vpop.f32.mrb[75].mxu0  ;;  %v2060_v51 = vpack.c.bf16 %v2032_v27, %v2030_v39 }
 0x20f   :  { %v2729_v52 = vadd.f32 %v1828_v46, %v4148_v49  ;;  %v2726_v59 = vadd.f32 %v2725_v41, %v1937_v40  ;;  %v2061_v60 = vpack.c.bf16 %v2033_v18, %v2031_v55 }
 0x210   :  { %v2002_v25 = vmul.f32 %v2724_v45, %v2724_v45  ;;  %v2728_v62 = vadd.f32 %v2727_v44, %v1939_v32 }
 0x211   :  { %v2003_v1 = vmul.f32 %v2726_v59, %v2726_v59  ;;  %v2730_v19 = vadd.f32 %v2729_v52, %v1941_v28  ;;  %2249 = vmatprep.mubr.bf16.mxu0 %v2061_v60 }
 0x212   :  { %v2004_v5 = vmul.f32 %v2728_v62, %v2728_v62  ;;  %2250 = vmatmul.mubr.bf16.gmra.mrb[84].mxu0 %v2060_v51  ;;  %v2034_v9 = vmul.f32 %v2724_v45, %v2002_v25 }
 0x213   :  { %v2005_v6 = vmul.f32 %v2730_v19, %v2730_v19  ;;  %v1832_v8 = vpop.f32.mrb[44].mxu1  ;;  %v1945_v54 = vpop.f32.mrb[76].mxu0  ;;  %v2035_v11 = vmul.f32 %v2726_v59, %v2003_v1 }
 0x214   :  { %v2036_v53 = vmul.f32 %v2728_v62, %v2004_v5  ;;  %v2731_v56 = vadd.f32 %v1832_v8, %v4144_v47  ;;  %v1834_v16 = vpop.f32.mrb[45].mxu1  ;;  %v1947_v10 = vpop.f32.mrb[77].mxu0 }
 0x215   :  { %v2037_v2 = vmul.f32 %v2730_v19, %v2005_v6  ;;  %v2733_v12 = vadd.f32 %v1834_v16, %v4148_v49  ;;  %v1836_v13 = vpop.f32.mrb[46].mxu1  ;;  %v1949_v14 = vpop.f32.mrb[78].mxu0 }
 0x216   :  { %v2735_v15 = vadd.f32 %v1836_v13, %v4144_v47  ;;  %v2732_v7 = vadd.f32 %v2731_v56, %v1945_v54  ;;  %v1838_v17 = vpop.f32.mrb[47].mxu1  ;;  %v1951_v0 = vpop.f32.mrb[79].mxu0  ;;  %v2062_v20 = vpack.c.bf16 %v2036_v53, %v2034_v9 }
 0x217   :  { %v2737_v22 = vadd.f32 %v1838_v17, %v4148_v49  ;;  %v2734_v4 = vadd.f32 %v2733_v12, %v1947_v10  ;;  %v2063_v63 = vpack.c.bf16 %v2037_v2, %v2035_v11 }
 0x218   :  { %v2006_v23 = vmul.f32 %v2732_v7, %v2732_v7  ;;  %v2736_v24 = vadd.f32 %v2735_v15, %v1949_v14 }
 0x219   :  { %v2007_v29 = vmul.f32 %v2734_v4, %v2734_v4  ;;  %v2738_v61 = vadd.f32 %v2737_v22, %v1951_v0  ;;  %2257 = vmatprep.mubr.bf16.mxu0 %v2063_v63 }
 0x21a   :  { %v2008_v30 = vmul.f32 %v2736_v24, %v2736_v24  ;;  %2258 = vmatmul.mubr.bf16.gmra.mrb[88].mxu0 %v2062_v20  ;;  %v2038_v50 = vmul.f32 %v2732_v7, %v2006_v23 }
 0x21b   :  { %v2009_v57 = vmul.f32 %v2738_v61, %v2738_v61  ;;  %v2039_v33 = vmul.f32 %v2734_v4, %v2007_v29 }
 0x21c   :  { %v2040_v21 = vmul.f32 %v2736_v24, %v2008_v30 }
 0x21d   :  { %v2041_v34 = vmul.f32 %v2738_v61, %v2009_v57 }
 0x21e   :  { %v2064_v48 = vpack.c.bf16 %v2040_v21, %v2038_v50 }
 0x21f   :  { %v2065_v35 = vpack.c.bf16 %v2041_v34, %v2039_v33 }
 0x221   :  { %2265 = vmatprep.mubr.bf16.mxu0 %v2065_v35 }
 0x222   :  { %2266 = vmatmul.mubr.bf16.gmra.mrb[92].mxu0 %v2064_v48 }
 0x23b   :  { %v1955_v3 = vpop.f32.mrb[48].mxu1 }
 0x23c   :  { %v2739_v37 = vadd.f32 %v1955_v3, %v4144_v47  ;;  %v1957_v38 = vpop.f32.mrb[49].mxu1 }
 0x23d   :  { %v2740_v58 = vadd.f32 %v1957_v38, %v4148_v49  ;;  %v1959_v42 = vpop.f32.mrb[50].mxu1 }
 0x23e   :  { %v2010_v26 = vmul.f32 %v2739_v37, %v2739_v37  ;;  %v2741_v39 = vadd.f32 %v1959_v42, %v4144_v47  ;;  %v1961_v27 = vpop.f32.mrb[51].mxu1 }
 0x23f   :  { %v2011_v31 = vmul.f32 %v2740_v58, %v2740_v58  ;;  %v2742_v36 = vadd.f32 %v1961_v27, %v4148_v49 }
 0x240   :  { %v2012_v40 = vmul.f32 %v2741_v39, %v2741_v39  ;;  %v2042_v18 = vmul.f32 %v2739_v37, %v2010_v26 }
 0x241   :  { %v2013_v55 = vmul.f32 %v2742_v36, %v2742_v36  ;;  %v2043_v43 = vmul.f32 %v2740_v58, %v2011_v31 }
 0x242   :  { %v2044_v41 = vmul.f32 %v2741_v39, %v2012_v40 }
 0x243   :  { %v2045_v32 = vmul.f32 %v2742_v36, %v2013_v55  ;;  %v1965_v44 = vpop.f32.mrb[52].mxu1 }
 0x244   :  { %v2743_v45 = vadd.f32 %v1965_v44, %v4144_v47  ;;  %v1967_v46 = vpop.f32.mrb[53].mxu1  ;;  %v2066_v28 = vpack.c.bf16 %v2044_v41, %v2042_v18 }
 0x245   :  { %v2744_v51 = vadd.f32 %v1967_v46, %v4148_v49  ;;  %v1969_v52 = vpop.f32.mrb[54].mxu1  ;;  %v2067_v59 = vpack.c.bf16 %v2045_v32, %v2043_v43 }
 0x246   :  { %v2014_v60 = vmul.f32 %v2743_v45, %v2743_v45  ;;  %v2745_v25 = vadd.f32 %v1969_v52, %v4144_v47  ;;  %v1971_v62 = vpop.f32.mrb[55].mxu1 }
 0x247   :  { %v2015_v1 = vmul.f32 %v2744_v51, %v2744_v51  ;;  %v2746_v19 = vadd.f32 %v1971_v62, %v4148_v49  ;;  %2273 = vmatprep.mubr.bf16.mxu0 %v2067_v59 }
 0x248   :  { %v2016_v5 = vmul.f32 %v2745_v25, %v2745_v25  ;;  %2274 = vmatmul.mubr.bf16.gmra.mrb[96].mxu0 %v2066_v28  ;;  %v2046_v8 = vmul.f32 %v2743_v45, %v2014_v60 }
 0x249   :  { %v2017_v6 = vmul.f32 %v2746_v19, %v2746_v19  ;;  %v2047_v9 = vmul.f32 %v2744_v51, %v2015_v1 }
 0x24a   :  { %v2048_v54 = vmul.f32 %v2745_v25, %v2016_v5 }
 0x24b   :  { %v2049_v53 = vmul.f32 %v2746_v19, %v2017_v6  ;;  %v1975_v56 = vpop.f32.mrb[56].mxu1 }
 0x24c   :  { %v2747_v16 = vadd.f32 %v1975_v56, %v4144_v47  ;;  %v1977_v10 = vpop.f32.mrb[57].mxu1  ;;  %v2068_v11 = vpack.c.bf16 %v2048_v54, %v2046_v8 }
 0x24d   :  { %v2748_v2 = vadd.f32 %v1977_v10, %v4148_v49  ;;  %v1979_v12 = vpop.f32.mrb[58].mxu1  ;;  %v2069_v13 = vpack.c.bf16 %v2049_v53, %v2047_v9 }
 0x24e   :  { %v2018_v14 = vmul.f32 %v2747_v16, %v2747_v16  ;;  %v2749_v15 = vadd.f32 %v1979_v12, %v4144_v47  ;;  %v1981_v7 = vpop.f32.mrb[59].mxu1 }
 0x24f   :  { %v2019_v17 = vmul.f32 %v2748_v2, %v2748_v2  ;;  %v2750_v0 = vadd.f32 %v1981_v7, %v4148_v49  ;;  %2281 = vmatprep.mubr.bf16.mxu0 %v2069_v13 }
 0x250   :  { %v2020_v20 = vmul.f32 %v2749_v15, %v2749_v15  ;;  %2282 = vmatmul.mubr.bf16.gmra.mrb[100].mxu0 %v2068_v11  ;;  %v2050_v4 = vmul.f32 %v2747_v16, %v2018_v14 }
 0x251   :  { %v2021_v22 = vmul.f32 %v2750_v0, %v2750_v0  ;;  %v2051_v23 = vmul.f32 %v2748_v2, %v2019_v17 }
 0x252   :  { %v2052_v63 = vmul.f32 %v2749_v15, %v2020_v20 }
 0x253   :  { %v2053_v24 = vmul.f32 %v2750_v0, %v2021_v22  ;;  %v1985_v29 = vpop.f32.mrb[60].mxu1 }
 0x254   :  { %v2751_v61 = vadd.f32 %v1985_v29, %v4144_v47  ;;  %v1987_v30 = vpop.f32.mrb[61].mxu1  ;;  %v2070_v57 = vpack.c.bf16 %v2052_v63, %v2050_v4 }
 0x255   :  { %v2752_v50 = vadd.f32 %v1987_v30, %v4148_v49  ;;  %v1989_v21 = vpop.f32.mrb[62].mxu1  ;;  %v2071_v33 = vpack.c.bf16 %v2053_v24, %v2051_v23 }
 0x256   :  { %v2022_v34 = vmul.f32 %v2751_v61, %v2751_v61  ;;  %v2753_v48 = vadd.f32 %v1989_v21, %v4144_v47  ;;  %v1991_v35 = vpop.f32.mrb[63].mxu1  ;;  %v4185_v47 = vld [vmem:[%s4257_s6] ss:$0 sm:$0xff] }
 0x257   :  { %v2023_v3 = vmul.f32 %v2752_v50, %v2752_v50  ;;  %v2754_v37 = vadd.f32 %v1991_v35, %v4148_v49  ;;  %2289 = vmatprep.mubr.bf16.mxu0 %v2071_v33 }
 0x258   :  { %v2024_v38 = vmul.f32 %v2753_v48, %v2753_v48  ;;  %2290 = vmatmul.mubr.bf16.gmra.mrb[104].mxu0 %v2070_v57  ;;  %v2054_v42 = vmul.f32 %v2751_v61, %v2022_v34 }
 0x259   :  { %v2025_v58 = vmul.f32 %v2754_v37, %v2754_v37  ;;  %v2055_v39 = vmul.f32 %v2752_v50, %v2023_v3 }
 0x25a   :  { %v2056_v26 = vmul.f32 %v2753_v48, %v2024_v38 }
 0x25b   :  { %v2057_v27 = vmul.f32 %v2754_v37, %v2025_v58 }
 0x25c   :  { %v2072_v31 = vpack.c.bf16 %v2056_v26, %v2054_v42 }
 0x25d   :  { %v2073_v36 = vpack.c.bf16 %v2057_v27, %v2055_v39 }
 0x25f   :  { %2297 = vmatprep.mubr.bf16.mxu0 %v2073_v36 }
 0x260   :  { %2298 = vmatmul.mubr.bf16.gmra.mrb[108].mxu0 %v2072_v31 }
 0x2dd   :  { %v2615_v40 = vpop.f32.mrb[80].mxu0 }
 0x2de   :  { %v2616_v55 = vpop.f32.mrb[81].mxu0 }
 0x2df   :  { %v2617_v49 = vadd.f32 %v2616_v55, %v2615_v40  ;;  %v2618_v18 = vpop.f32.mrb[82].mxu0 }
 0x2e0   :  { %v2619_v41 = vpop.f32.mrb[83].mxu0 }
 0x2e1   :  { %v2244_v43 = vadd.f32 %v2617_v49, %v4185_v47  ;;  %v2620_v32 = vadd.f32 %v2619_v41, %v2618_v18 }
 0x2e3   :  { %v2306_v44 = vmax.f32 %v2244_v43, 0.0  ;;  %v2247_v45 = vadd.f32 %v2620_v32, %v4185_v47 }
 0x2e5   :  { %2322 = vst [vmem:[%s4258_s7] sm:$0xff] %v2306_v44  ;;  %v2307_v46 = vmax.f32 %v2247_v45, 0.0  ;;  %v2621_v28 = vpop.f32.mrb[84].mxu0 }
 0x2e6   :  { %v2622_v51 = vpop.f32.mrb[85].mxu0 }
 0x2e7   :  { %2323 = vst [vmem:[%s4258_s7 + $0x8] sm:$0xff] %v2307_v46  ;;  %v2623_v52 = vadd.f32 %v2622_v51, %v2621_v28  ;;  %v2624_v59 = vpop.f32.mrb[86].mxu0 }
 0x2e8   :  { %v2625_v60 = vpop.f32.mrb[87].mxu0 }
 0x2e9   :  { %v2252_v25 = vadd.f32 %v2623_v52, %v4185_v47  ;;  %v2626_v62 = vadd.f32 %v2625_v60, %v2624_v59 }
 0x2eb   :  { %v2308_v1 = vmax.f32 %v2252_v25, 0.0  ;;  %v2255_v19 = vadd.f32 %v2626_v62, %v4185_v47 }
 0x2ed   :  { %2324 = vst [vmem:[%s4258_s7 + $0x10] sm:$0xff] %v2308_v1  ;;  %v2309_v5 = vmax.f32 %v2255_v19, 0.0  ;;  %v2627_v6 = vpop.f32.mrb[88].mxu0 }
 0x2ee   :  { %v2628_v8 = vpop.f32.mrb[89].mxu0 }
 0x2ef   :  { %2325 = vst [vmem:[%s4258_s7 + $0x18] sm:$0xff] %v2309_v5  ;;  %v2629_v54 = vadd.f32 %v2628_v8, %v2627_v6  ;;  %v2630_v9 = vpop.f32.mrb[90].mxu0 }
 0x2f0   :  { %v2631_v53 = vpop.f32.mrb[91].mxu0 }
 0x2f1   :  { %v2260_v56 = vadd.f32 %v2629_v54, %v4185_v47  ;;  %v2632_v16 = vadd.f32 %v2631_v53, %v2630_v9 }
 0x2f3   :  { %v2310_v10 = vmax.f32 %v2260_v56, 0.0  ;;  %v2263_v11 = vadd.f32 %v2632_v16, %v4185_v47 }
 0x2f5   :  { %2326 = vst [vmem:[%s4258_s7 + $0x20] sm:$0xff] %v2310_v10  ;;  %v2311_v2 = vmax.f32 %v2263_v11, 0.0  ;;  %v2633_v12 = vpop.f32.mrb[92].mxu0 }
 0x2f6   :  { %v2634_v13 = vpop.f32.mrb[93].mxu0 }
 0x2f7   :  { %2327 = vst [vmem:[%s4258_s7 + $0x28] sm:$0xff] %v2311_v2  ;;  %v2635_v14 = vadd.f32 %v2634_v13, %v2633_v12  ;;  %v2636_v15 = vpop.f32.mrb[94].mxu0 }
 0x2f8   :  { %v2637_v7 = vpop.f32.mrb[95].mxu0 }
 0x2f9   :  { %v2268_v17 = vadd.f32 %v2635_v14, %v4185_v47  ;;  %v2638_v0 = vadd.f32 %v2637_v7, %v2636_v15 }
 0x2fb   :  { %v2312_v20 = vmax.f32 %v2268_v17, 0.0  ;;  %v2271_v22 = vadd.f32 %v2638_v0, %v4185_v47 }
 0x2fd   :  { %2328 = vst [vmem:[%s4258_s7 + $0x30] sm:$0xff] %v2312_v20  ;;  %v2313_v4 = vmax.f32 %v2271_v22, 0.0 }
 0x2ff   :  { %2329 = vst [vmem:[%s4258_s7 + $0x38] sm:$0xff] %v2313_v4 }
 0x31b   :  { %v2639_v63 = vpop.f32.mrb[96].mxu0 }
 0x31c   :  { %v2640_v23 = vpop.f32.mrb[97].mxu0 }
 0x31d   :  { %v2641_v24 = vadd.f32 %v2640_v23, %v2639_v63  ;;  %v2642_v29 = vpop.f32.mrb[98].mxu0 }
 0x31e   :  { %v2643_v61 = vpop.f32.mrb[99].mxu0 }
 0x31f   :  { %v2276_v30 = vadd.f32 %v2641_v24, %v4185_v47  ;;  %v2644_v57 = vadd.f32 %v2643_v61, %v2642_v29 }
 0x321   :  { %v2314_v50 = vmax.f32 %v2276_v30, 0.0  ;;  %v2279_v21 = vadd.f32 %v2644_v57, %v4185_v47 }
 0x323   :  { %2330 = vst [vmem:[%s4258_s7 + $0x40] sm:$0xff] %v2314_v50  ;;  %v2315_v33 = vmax.f32 %v2279_v21, 0.0  ;;  %v2645_v34 = vpop.f32.mrb[100].mxu0 }
 0x324   :  { %v2646_v48 = vpop.f32.mrb[101].mxu0 }
 0x325   :  { %2331 = vst [vmem:[%s4258_s7 + $0x48] sm:$0xff] %v2315_v33  ;;  %v2647_v35 = vadd.f32 %v2646_v48, %v2645_v34  ;;  %v2648_v3 = vpop.f32.mrb[102].mxu0 }
 0x326   :  { %v2649_v37 = vpop.f32.mrb[103].mxu0 }
 0x327   :  { %v2284_v38 = vadd.f32 %v2647_v35, %v4185_v47  ;;  %v2650_v58 = vadd.f32 %v2649_v37, %v2648_v3 }
 0x329   :  { %v2316_v42 = vmax.f32 %v2284_v38, 0.0  ;;  %v2287_v26 = vadd.f32 %v2650_v58, %v4185_v47 }
 0x32b   :  { %2332 = vst [vmem:[%s4258_s7 + $0x50] sm:$0xff] %v2316_v42  ;;  %v2317_v39 = vmax.f32 %v2287_v26, 0.0  ;;  %v2651_v27 = vpop.f32.mrb[104].mxu0 }
 0x32c   :  { %v2652_v31 = vpop.f32.mrb[105].mxu0 }
 0x32d   :  { %2333 = vst [vmem:[%s4258_s7 + $0x58] sm:$0xff] %v2317_v39  ;;  %v2653_v36 = vadd.f32 %v2652_v31, %v2651_v27  ;;  %v2654_v40 = vpop.f32.mrb[106].mxu0 }
 0x32e   :  { %v2655_v55 = vpop.f32.mrb[107].mxu0 }
 0x32f   :  { %v2292_v49 = vadd.f32 %v2653_v36, %v4185_v47  ;;  %v2656_v18 = vadd.f32 %v2655_v55, %v2654_v40 }
 0x331   :  { %v2318_v41 = vmax.f32 %v2292_v49, 0.0  ;;  %v2295_v43 = vadd.f32 %v2656_v18, %v4185_v47 }
 0x333   :  { %2334 = vst [vmem:[%s4258_s7 + $0x60] sm:$0xff] %v2318_v41  ;;  %v2319_v32 = vmax.f32 %v2295_v43, 0.0  ;;  %v2657_v44 = vpop.f32.mrb[108].mxu0 }
 0x334   :  { %v2658_v45 = vpop.f32.mrb[109].mxu0 }
 0x335   :  { %2335 = vst [vmem:[%s4258_s7 + $0x68] sm:$0xff] %v2319_v32  ;;  %v2659_v46 = vadd.f32 %v2658_v45, %v2657_v44  ;;  %v2660_v28 = vpop.f32.mrb[110].mxu0 }
 0x336   :  { %v2661_v51 = vpop.f32.mrb[111].mxu0 }
 0x337   :  { %v2300_v52 = vadd.f32 %v2659_v46, %v4185_v47  ;;  %v2662_v59 = vadd.f32 %v2661_v51, %v2660_v28 }
 0x339   :  { %v2320_v60 = vmax.f32 %v2300_v52, 0.0  ;;  %v2303_v25 = vadd.f32 %v2662_v59, %v4185_v47 }
 0x33b   :  { %2336 = vst [vmem:[%s4258_s7 + $0x70] sm:$0xff] %v2320_v60  ;;  %v2321_v62 = vmax.f32 %v2303_v25, 0.0 }
 0x33d   :  { %2337 = vst [vmem:[%s4258_s7 + $0x78] sm:$0xff] %v2321_v62 }

</bundles_post_ra>
